<compile_context>
chip_gen: v7x
topology: tpu7x:2x2x1
jax: 0.10.0
libtpu: 0.0.40
codegen_flags: <defaults>
</compile_context>

<pallas_src>
import math

import jax
import jax.numpy as jnp
from jax.experimental import pallas as pl
from jax.experimental.pallas import tpu as pltpu


def _vdn_group_sum_kernel(x_ref, ones_ref, o_ref):
    # x_ref:    (T, n_agents*128)   lane-dense slab of q-values (agent fastest)
    # ones_ref: (n_agents*128, 128) constant block-diagonal 0/1 matrix
    # o_ref:    (T, 128)            lane-dense per-row agent sums
    x = x_ref[...]
    if x.dtype != jnp.float32:
        x = x.astype(jnp.float32)          # bf16 in -> f32 accumulate
    acc = jnp.dot(
        x,
        ones_ref[...],
        preferred_element_type=jnp.float32,
        precision=jax.lax.Precision.HIGHEST,   # exact fp32 contract on the MXU
    )
    o_ref[...] = acc.astype(o_ref.dtype)


def vdn_forward(q_values, *, block_rows=None, min_pallas_elements=128 * 1024):
    """torch.sum(q_values, dim=2, keepdim=True).

    block_rows:          override for the per-block sublane count of the
                         (n_rows/128, n_agents*128) view (testing / tuning).
    min_pallas_elements: inputs smaller than this use the XLA fast path.
    """
    q = jnp.asarray(q_values)
    if q.ndim < 3:
        raise ValueError(
            "VDNNet expects q_values with at least 3 dims (dim=2 is reduced)")

    n_agents = q.shape[2]
    # Move the reduced axis (dim=2) last; a no-op view for the rank-3 case.
    moved = jnp.moveaxis(q, 2, -1)
    lead_shape = moved.shape[:-1]
    n_rows = math.prod(lead_shape)
    total = n_rows * n_agents

    pallas_ok = (
        q.dtype in (jnp.float32, jnp.bfloat16)
        and n_agents >= 1
        and 128 % n_agents == 0          # agents pack into whole 128-lane groups
        and n_rows % 128 == 0            # keeps every reshape below a free view
        and n_rows >= 8 * 128            # at least one (8, 128) output block
        and total >= min_pallas_elements
    )
    if not pallas_ok:
        # Fast path / fallback: tiny inputs, odd agent counts, ragged row
        # counts or exotic dtypes — XLA's fused reduce wins here and we avoid
        # any pad / relayout copy of the input.
        # TODO(synk): in-kernel ragged-row masking would let n_rows % 128 != 0
        # take the Pallas path without an extra copy.
        return jnp.sum(q, axis=2, keepdims=True)

    lanes_in = n_agents * 128
    n_rows2d = n_rows // 128
    itemsize = q.dtype.itemsize

    # Block sizing: ~2 MiB of input per grid step (measured sweet spot for a
    # memory-bound op), sublane count a multiple of 8, clamped to the array.
    if block_rows is None:
        t = max(8, (2 * 1024 * 1024) // (lanes_in * itemsize))
    else:
        t = max(8, int(block_rows))
    t = (t // 8) * 8
    t = min(t, max(8, (n_rows2d // 8) * 8))

    grid = (pl.cdiv(n_rows2d, t),)   # ragged last block is masked by Pallas

    # Free view: contiguous (row, agent) buffer -> (n_rows/128, n_agents*128).
    x2d = moved.reshape(n_rows2d, lanes_in)

    # Constant block-diagonal 0/1 matrix: ones[c, l] = 1 iff c // n_agents == l.
    ones_mat = (
        (jnp.arange(lanes_in, dtype=jnp.int32)[:, None] // n_agents)
        == jnp.arange(128, dtype=jnp.int32)[None, :]
    ).astype(jnp.float32)

    out2d = pl.pallas_call(
        _vdn_group_sum_kernel,
        out_shape=jax.ShapeDtypeStruct((n_rows2d, 128), q.dtype),
        grid=grid,
        in_specs=[
            pl.BlockSpec((t, lanes_in), lambda i: (i, 0)),
            pl.BlockSpec((lanes_in, 128), lambda i: (0, 0)),  # resident constant
        ],
        out_specs=pl.BlockSpec((t, 128), lambda i: (i, 0)),
        compiler_params=pltpu.CompilerParams(
            dimension_semantics=("parallel",)),
        cost_estimate=pl.CostEstimate(
            flops=2 * n_rows2d * lanes_in * 128,
            transcendentals=0,
            bytes_accessed=(n_rows2d * lanes_in + n_rows2d * 128) * itemsize),
    )(x2d, ones_mat)

    # Free views back: (n_rows/128, 128) -> lead_shape, keepdim at axis 2.
    return jnp.expand_dims(out2d.reshape(lead_shape), 2)


if __name__ == "__main__":
    key = jax.random.PRNGKey(0)
    k1, k2, k3 = jax.random.split(key, 3)

    # 1) Pallas path: n_rows = 5*512 = 2560 (divisible by 128), n_agents = 4.
    #    block_rows=8 gives a 3-step grid including a partial final block, and
    #    min_pallas_elements=0 forces the Pallas path at this small test size.
    q1 = jax.random.normal(k1, (5, 512, 4), jnp.float32)
    out1 = jax.block_until_ready(
        vdn_forward(q1, block_rows=8, min_pallas_elements=0))
    ref1 = jnp.sum(q1, axis=2, keepdims=True)
    assert out1.shape == (5, 512, 1)
    assert jnp.allclose(out1, ref1, atol=2e-5, rtol=1e-5)

    # 2) Typical tiny VDN mixer shape -> small-input fast path (jnp.sum).
    q2 = jax.random.normal(k2, (2, 8, 4), jnp.float32)
    out2 = jax.block_until_ready(vdn_forward(q2))
    ref2 = jnp.sum(q2, axis=2, keepdims=True)
    assert out2.shape == (2, 8, 1)
    assert jnp.allclose(out2, ref2, atol=1e-6, rtol=1e-6)

    # 3) Odd agent count / ragged row count -> fallback path.
    q3 = jax.random.normal(k3, (3, 70, 5), jnp.float32)
    out3 = jax.block_until_ready(vdn_forward(q3))
    ref3 = jnp.sum(q3, axis=2, keepdims=True)
    assert out3.shape == (3, 70, 1)
    assert jnp.allclose(out3, ref3, atol=1e-6, rtol=1e-6)

    print("KERNEL_OK")
</pallas_src>

<mosaic_0001>
module attributes {stable_mosaic.version = 11 : i64} {
  func.func @_vdn_group_sum_kernel(%arg0: i32, %arg1: memref<8x512xf32, #tpu.memory_space<vmem>>, %arg2: memref<512x128xf32, #tpu.memory_space<vmem>>, %arg3: memref<8x128xf32, #tpu.memory_space<vmem>>) attributes {dimension_semantics = [#tpu.dimension_semantics<parallel>], iteration_bounds = array<i64: 3>, scalar_prefetch = 0 : i64, scratch_operands = 0 : i64, tpu.core_type = #tpu.core_type<tc>, window_params = [{transform_indices = @transform_0, window_bounds = array<i64: 8, 512>}, {pipeline_mode = #tpu.pipeline_mode<synchronous>, transform_indices = @transform_1, window_bounds = array<i64: 512, 128>}, {transform_indices = @transform_2, window_bounds = array<i64: 8, 128>}]} {
    %c0 = arith.constant 0 : index
    %c0_0 = arith.constant 0 : index
    %0 = vector.load %arg1[%c0, %c0_0] : memref<8x512xf32, #tpu.memory_space<vmem>>, vector<8x512xf32>
    %c0_1 = arith.constant 0 : index
    %c0_2 = arith.constant 0 : index
    %1 = vector.load %arg2[%c0_1, %c0_2] : memref<512x128xf32, #tpu.memory_space<vmem>>, vector<512x128xf32>
    %cst = arith.constant dense<0.000000e+00> : vector<8x128xf32>
    %2 = tpu.matmul %0, %1, %cst {dimension_numbers = #tpu.dot_dimension_numbers<[1], [0], [0], [1], [0, 0, 1, 1], [], []>, precision = #tpu.contract_precision<fp32>} : vector<8x512xf32>, vector<512x128xf32>, vector<8x128xf32> -> vector<8x128xf32>
    %c0_3 = arith.constant 0 : index
    %c0_4 = arith.constant 0 : index
    %3 = vector.load %arg3[%c0_3, %c0_4] : memref<8x128xf32, #tpu.memory_space<vmem>>, vector<8x128xf32>
    tpu.vector_store %arg3[%c0_3, %c0_4], %2 {strides = array<i32>} : memref<8x128xf32, #tpu.memory_space<vmem>>, vector<8x128xf32>,
    return
  }
  func.func @transform_0(%arg0: i32) -> (i32, i32) {
    %c0_i32 = arith.constant 0 : i32
    %c0_i32_0 = arith.constant 0 : i32
    return %arg0, %c0_i32 : i32, i32
  }
  func.func @transform_1(%arg0: i32) -> (i32, i32) {
    %c0_i32 = arith.constant 0 : i32
    %c0_i32_0 = arith.constant 0 : i32
    %c0_i32_1 = arith.constant 0 : i32
    return %c0_i32, %c0_i32_0 : i32, i32
  }
  func.func @transform_2(%arg0: i32) -> (i32, i32) {
    %c0_i32 = arith.constant 0 : i32
    %c0_i32_0 = arith.constant 0 : i32
    return %arg0, %c0_i32 : i32, i32
  }
}

</mosaic_0001>

<bundles_post_ra>
// kernel: tpu_custom_call.1
= control target key start
LH: loop header
LB: loop body
LE: loop exit
PB: predicated region body
PF: predicated region fallthrough
CT: control target
= control target key end

     0   :  { %7 = vsyncpa [#allocation3], 0  ;;  %s4154_s0 = inlined_call_operand.hbm [shape: f32[20,512], index: 0, kind: input, shape index: {}]   ;;  %s4155_s1 = inlined_call_operand.hbm [shape: f32[512,128], index: 1, kind: input, shape index: {}]   ;;  %s4156_s2 = inlined_call_operand.hbm [shape: f32[20,128], index: 2, kind: output, shape index: {}]  }
   0x1   :  { %9 = vsyncpa [#allocation3 + $0x1], 0 }
   0x2   :  { %10 = vsyncpa [#allocation6], 0 }
   0x3   :  { %11 = vsyncpa [#allocation4], 0 }
   0x4   :  { %13 = vsyncpa [#allocation4 + $0x1], 0  ;;  %s3091_s9 = smov 0   ;;  %s3093_s10 = smov 0  }
   0x5   :  { %s3095_s11 = smov 0   ;;  %s3097_s12 = smov 0  }
   0x6 LB: > { %s3112_s13 = sadd.s32 4294967295, %s3069_s12   ;;  %s2062_s14 = sadd.s32 4294967294, %s3069_s12   ;;  %s3069_s12 = sphi %s3097_s12, %s4379_s12   ;;  %s3065_s11 = sphi %s3095_s11, %s4378_s11   ;;  %s3061_s10 = sphi %s3093_s10, %s4377_s10   ;;  %s3057_s9 = sphi %s3091_s9, %s4376_s9  }
   0x7   : > { %p39_p0 = scmp.ne.s32.totalorder %s3061_s10, %s3057_s9  ;;  %p4157_p1 = scmp.eq.s32.totalorder %s3112_s13, 0 }
   0x8   : > { %p90_p3 = scmp.eq.s32.totalorder %s2062_s14, 2  ;;  %p2063_p5 = scmp.ge.s32.totalorder %s3069_s12, 1 }
   0x9   : > { %p3121_p4 = por %p4157_p1, %p39_p0  ;;  %p97_p7 = scmp.lt.s32.totalorder %s3069_s12, 4 }
   0xa   : > { %p3126_p6 = por %p90_p3, %p39_p0  ;;  %s3071_s18 = smov [#allocation5]  }
   0xb   : > { %s4251_s15 = scalar_select %p3121_p4, 1, 0 }
   0xc   : > { %s4252_s16 = scalar_select %p3126_p6, 1, 0 }
   0xd   : > { %p3131_p8 = pnand %p2063_p5, %p97_p7  ;;  %s109_s19 = sshll.u32 %s3071_s18, 4  ;;  %s110_s19 = int_to_ptr.vmem [resolvable:$true] %s109_s19 }
   0xe   : > { %s3144_s21 = sadd.s32 1, %s3069_s12   ;;  %s26_s22 = sadd.s32 1, %s3065_s11 }
   0xf   : > { %s4253_s17 = scalar_select %p3131_p8, 1, 0 }
  0x10   : > { %p2890_p9 = pneg %p3131_p8  ;;  %s23_s23 = ssub.s32 %s3069_s12, %s3144_s21 }
  0x11   : > { %s2941_s26 = scalar_lea.hbm %s4155_s1, 8192 }
  0x12   : > { %p3139_p10 = pnand %p2890_p9, %p4157_p1  ;;  %p2942_p11 = scmp.ne.s32.totalorder %s4155_s1, %s2941_s26 }
  0x13   : > { %p2948_p3 = scmp.lt.u32.totalorder %s2941_s26, %s4155_s1 }
  0x14   : > { %p2943_p12 = pneg %p3139_p10 }
  0x16   : > { %p2944_p13 = pnand %p2943_p12, %p2942_p11 }
  0x18   : > { %p2945_p0 = pneg %p2944_p13 }
  0x1a   : > { %p2950_p5 = pnand %p2948_p3, %p2945_p0 }
  0x1c   : > { %2953 = shalt.err (!%p2950_p5)
}
  0x1d   : > { %s2954_s3 = scalar_lea.vmem %s110_s19, 8192  ;;  %p2962_p2 = scmp.lt.s32.totalorder %s110_s19, %s110_s19 }
  0x1e   : > { %p2955_p7 = scmp.ne.s32.totalorder %s110_s19, %s2954_s3  ;;  %p2963_p6 = scmp.lt.s32.totalorder %s2954_s3, %s2954_s3 }
  0x20   : > { %p2957_p9 = pnand %p2955_p7, %p2943_p12  ;;  %p2964_p4 = por %p2963_p6, %p2962_p2 }
  0x22   : > { %p2958_p1 = pneg %p2957_p9 }
  0x24   : > { %p2965_p8 = pnand %p2964_p4, %p2958_p1 }
  0x26   : > { %2968 = shalt.err (!%p2965_p8)
}
  0x27   : > { %s3072_s4 = smov 128   ;;  %s3073_s5 = smov 8  }
  0x28   : > { %2893 = dma.hbm_to_vmem [thread:$0]  (!%p3139_p10), %s4155_s1, 8192, %s110_s19, [#allocation6], %s3072_s4, %s3072_s4, %s3073_s5  }
  0x29   : > { %p24_p11 = scmp.eq.s32.totalorder %s23_s23, 0  ;;  %p33_p2 = scmp.ne.s32.totalorder %s3065_s11, %s3061_s10 }
  0x2a   : > { %p34_p1 = scmp.eq.s32.totalorder %s3069_s12, 0  ;;  %p2903_p4 = scmp.lt.s32.totalorder %s3069_s12, 3 }
  0x2b   : > { %s3170_s8 = scalar_select %p24_p11, %s3065_s11, %s26_s22  }
  0x2c   : > { %p35_p6 = por %p34_p1, %p33_p2  ;;  %p4255_p8 = scmp.eq.s32.totalorder %s3112_s13, 2 }
  0x2d   : > { %s123_s18 = sand.u32 1, %s3065_s11   ;;  %s2077_s24 = sshll.u32 %s3069_s12, 9 }
  0x2e   : > { %p3174_p12 = por %p4255_p8, %p33_p2  ;;  %s2066_s25 = sshll.u32 %s123_s18, 5 }
  0x2f   : > { %s3183_s27 = scalar_lea.hbm %s4154_s0, %s2077_s24  ;;  %s127_s19 = scalar_lea.vmem [#allocation2], %s2066_s25 }
  0x30   : > { %s135_s22 = sshll.u32 %s127_s19, 4  ;;  %p3185_p10 = pnand %p2903_p4, %p35_p6  ;;  %s3189_s22 = int_to_ptr.vmem [resolvable:$true] %s135_s22 }
  0x31   : > { %s124_s28 = scalar_lea.sflag [#allocation3], %s123_s18  ;;  %s2969_s29 = scalar_lea.hbm %s3183_s27, 512 }
  0x32   : > { %p2970_p13 = scmp.ne.s32.totalorder %s3183_s27, %s2969_s29  ;;  %p2971_p0 = pneg %p3185_p10 }
  0x33   : > { %s2974_s4 = scalar_lea.hbm %s4154_s0, 1536  ;;  %p2975_p7 = scmp.lt.u32.totalorder %s3183_s27, %s4154_s0 }
  0x34   : > { %p2972_p3 = pnand %p2971_p0, %p2970_p13  ;;  %p2976_p9 = scmp.lt.u32.totalorder %s2974_s4, %s2969_s29 }
  0x35   : > { %p2978_p2 = scmp.lt.u32.totalorder %s2969_s29, %s3183_s27 }
  0x36   : > { %p2973_p5 = pneg %p2972_p3  ;;  %p2977_p11 = por %p2976_p9, %p2975_p7 }
  0x38   : > { %p2979_p1 = por %p2978_p2, %p2977_p11 }
  0x3a   : > { %p2980_p4 = pnand %p2979_p1, %p2973_p5 }
  0x3c   : > { %2983 = shalt.err (!%p2980_p4)
}
  0x3d   : > { %s2984_s7 = scalar_lea.vmem %s3189_s22, 512  ;;  %s3074_s18 = smov [#allocation2]  }
  0x3e   : > { %p2985_p6 = scmp.ne.s32.totalorder %s3189_s22, %s2984_s7  ;;  %s2989_s24 = sshll.u32 %s3074_s18, 4  ;;  %s2990_s24 = int_to_ptr.vmem [resolvable:$false] %s2989_s24 }
  0x3f   : > { %s2991_s25 = scalar_lea.vmem %s2990_s24, 1024  ;;  %p2992_p3 = scmp.lt.s32.totalorder %s3189_s22, %s2990_s24 }
  0x40   : > { %p2987_p8 = pnand %p2985_p6, %p2971_p0  ;;  %p2993_p7 = scmp.lt.s32.totalorder %s2991_s25, %s2984_s7 }
  0x42   : > { %p2988_p13 = pneg %p2987_p8  ;;  %p2994_p9 = por %p2993_p7, %p2992_p3 }
  0x44   : > { %p2995_p11 = pnand %p2994_p9, %p2988_p13 }
  0x46   : > { %2998 = shalt.err (!%p2995_p11)
}
  0x47   : > { %2897 = dma.hbm_to_vmem [thread:$0]  (!%p3185_p10), %s3183_s27, 512, %s3189_s22, %s124_s28  }
  0x48   : > { %p4258_p5 = scmp.ne.s32.totalorder %s4253_s17, 0 }
  0x4a   : > { %144 = sbr.rel (%p4258_p5) target bundleno = 540 (0x21c), region = 28 }
  0x51   : > { %s3219_s20 = sand.u32 1, %s3061_s10   ;;  %p4259_p0 = scmp.ne.s32.totalorder %s4251_s15, 0 }
  0x52   : > { %s2070_s26 = sshll.u32 %s3219_s20, 5  ;;  %s147_s19 = scalar_lea.sflag [#allocation3], %s3219_s20 }
  0x53   : > { %s3223_s29 = scalar_lea.vmem [#allocation2], %s2070_s26 }
  0x54   : > { %3044 = dma.done.wait (%p4259_p0), %s147_s19, 512  }
  0x55   : > { %3046 = vsyncadd (%p4259_p0), %s147_s19, 4294966784  ;;  %p4260_p10 = scmp.eq.s32.totalorder %s3112_s13, 0 }
  0x57   : > { %3048 = dma.done.wait (%p4260_p10), [#allocation6], 8192   ;;  %p4261_p2 = pmov %p4260_p10 }
  0x58   : > { %v195_v0 = vld [vmem:[#allocation5 + $0x80] sm:$0xff]  ;;  %v196_v1 = vld [vmem:[#allocation5 + $0x88] sm:$0xff]  ;;  %v197_v7 = vld [vmem:[#allocation5 + $0x90] sm:$0xff]  ;;  %s2072_s15 = sshll.u32 %s3219_s20, 3  ;;  %s2074_s17 = sshll.u32 %s3112_s13, 7 }
  0x59   : > { %3050 = vsyncadd (%p4261_p2), [#allocation6], 4294959104  ;;  %v179_v2 = vld [vmem:[#allocation5] sm:$0xff]  ;;  %v292_v3 = vand.u32 4294901760, %v195_v0  ;;  %v295_v4 = vand.u32 4294901760, %v196_v1  ;;  %v180_v5 = vld [vmem:[#allocation5 + $0x8] sm:$0xff]  ;;  %s4111_s30 = scalar_lea.hbm %s4156_s2, %s2074_s17 }
  0x5a   : > { %v244_v6 = vand.u32 4294901760, %v179_v2  ;;  %v198_v8 = vld [vmem:[#allocation5 + $0x98] sm:$0xff]  ;;  %v247_v9 = vand.u32 4294901760, %v180_v5  ;;  %v298_v10 = vand.u32 4294901760, %v197_v7  ;;  %v181_v12 = vld [vmem:[#allocation5 + $0x10] sm:$0xff]  ;;  %v199_v18 = vld [vmem:[#allocation5 + $0xa0] sm:$0xff] }
  0x5b   : > { %v301_v11 = vand.u32 4294901760, %v198_v8  ;;  %v182_v13 = vld [vmem:[#allocation5 + $0x18] sm:$0xff]  ;;  %v3233_v14 = vpack.c.bf16 %v295_v4, %v292_v3  ;;  %v250_v16 = vand.u32 4294901760, %v181_v12  ;;  %v200_v19 = vld [vmem:[#allocation5 + $0xa8] sm:$0xff]  ;;  %v183_v23 = vld [vmem:[#allocation5 + $0x20] sm:$0xff]  ;;  %v304_v29 = vand.u32 4294901760, %v199_v18 }
  0x5c   : > { %v3235_v15 = vsub.f32 %v179_v2, %v244_v6  ;;  %v253_v17 = vand.u32 4294901760, %v182_v13  ;;  %v3237_v20 = vpack.c.bf16 %v247_v9, %v244_v6  ;;  %v3239_v21 = vsub.f32 %v180_v5, %v247_v9  ;;  %v184_v24 = vld [vmem:[#allocation5 + $0x28] sm:$0xff]  ;;  %v201_v37 = vld [vmem:[#allocation5 + $0xb0] sm:$0xff]  ;;  %v202_v42 = vld [vmem:[#allocation5 + $0xb8] sm:$0xff]  ;;  %s174_s27 = scalar_lea.vmem [#allocation7], %s2072_s15  ;;  %s1969_s3 = scalar_lea.sflag [#allocation4], %s3219_s20 }
  0x5d   : > { %v3241_v22 = vpack.c.bf16 %v301_v11, %v298_v10  ;;  %2499 = vmatprep.subr.bf16.mxu0 %v3233_v14  ;;  %v3244_v25 = vsub.f32 %v197_v7, %v298_v10  ;;  %v3246_v26 = vsub.f32 %v198_v8, %v301_v11  ;;  %v3250_v28 = vsub.f32 %v181_v12, %v250_v16  ;;  %v185_v55 = vld [vmem:[#allocation5 + $0x30] sm:$0xff]  ;;  %v186_v56 = vld [vmem:[#allocation5 + $0x38] sm:$0xff]  ;;  %v203_v5 = vld [vmem:[#allocation5 + $0xc0] sm:$0xff]  ;;  %s1982_s22 = sshll.u32 %s174_s27, 4  ;;  %s3075_s13 = smov [#allocation7]   ;;  %s4113_s22 = int_to_ptr.vmem [resolvable:$true] %s1982_s22 }
  0x5e   : > { %v3248_v27 = vpack.c.bf16 %v253_v17, %v250_v16  ;;  %2501 = vmatpush3.bf16.msra.mxu0 %v3237_v20  ;;  %v307_v30 = vand.u32 4294901760, %v200_v19  ;;  %v3253_v31 = vsub.f32 %v195_v0, %v292_v3  ;;  %v3255_v32 = vsub.f32 %v196_v1, %v295_v4  ;;  %v204_v6 = vld [vmem:[#allocation5 + $0xc8] sm:$0xff]  ;;  %v187_v11 = vld [vmem:[#allocation5 + $0x40] sm:$0xff]  ;;  %s2999_s4 = scalar_lea.vmem %s4113_s22, 128  ;;  %s3003_s5 = sshll.u32 %s3075_s13, 4  ;;  %s3004_s5 = int_to_ptr.vmem [resolvable:$false] %s3003_s5 }
  0x5f   : > { %2503 = vmatprep.subr.bf16.mxu0 %v3241_v22  ;;  %v256_v33 = vand.u32 4294901760, %v183_v23  ;;  %v259_v34 = vand.u32 4294901760, %v184_v24  ;;  %v4176_v35 = vand.u32 4294901760, %v3235_v15  ;;  %v4174_v36 = vand.u32 4294901760, %v3239_v21  ;;  %p3000_p1 = scmp.ne.s32.totalorder %s4113_s22, %s2999_s4  ;;  %s3005_s6 = scalar_lea.vmem %s3004_s5, 256 }
  0x60   : > { %v3260_v38 = vsub.f32 %v182_v13, %v253_v17  ;;  %v3262_v39 = vpack.c.bf16 %v307_v30, %v304_v29  ;;  %v3264_v40 = vsub.f32 %v199_v18, %v304_v29  ;;  %v4179_v41 = vand.u32 4294901760, %v3253_v31  ;;  %v188_v29 = vld [vmem:[#allocation5 + $0x48] sm:$0xff]  ;;  %p3006_p8 = scmp.lt.s32.totalorder %s4113_s22, %s3004_s5  ;;  %p3007_p13 = scmp.lt.s32.totalorder %s3005_s6, %s2999_s4 }
  0x61   : > { %v3267_v43 = vsub.f32 %v200_v19, %v307_v30  ;;  %v4178_v44 = vand.u32 4294901760, %v3255_v32  ;;  %v3270_v45 = vpack.c.bf16 %v259_v34, %v256_v33  ;;  %v3272_v46 = vsub.f32 %v183_v23, %v256_v33  ;;  %p3001_p4 = pnand %p3000_p1, %p3174_p12 }
  0x62   : > { %2505 = vmatpush3.bf16.msra.mxu0 %v3248_v27  ;;  %v471_v47 = vsub.f32 %v3253_v31, %v4179_v41  ;;  %v359_v48 = vsub.f32 %v3235_v15, %v4176_v35  ;;  %v366_v49 = vsub.f32 %v3239_v21, %v4174_v36  ;;  %v310_v50 = vand.u32 4294901760, %v201_v37  ;;  %v176_v41 = vld [vmem:[%s3223_s29 + $0x8] sm:$0xff]  ;;  %p3008_p3 = por %p3007_p13, %p3006_p8 }
  0x63   : > { %2507 = vmatprep.subr.bf16.mxu0 %v3262_v39  ;;  %v478_v51 = vsub.f32 %v3255_v32, %v4178_v44  ;;  %v313_v52 = vand.u32 4294901760, %v202_v42  ;;  %v4172_v53 = vand.u32 4294901760, %v3244_v25  ;;  %v4170_v54 = vand.u32 4294901760, %v3246_v26  ;;  %p3002_p6 = pneg %p3001_p4 }
  0x64   : > { %v472_v57 = vand.u32 4294901760, %v471_v47  ;;  %v3290_v58 = vsub.f32 %v184_v24, %v259_v34  ;;  %v360_v59 = vand.u32 4294901760, %v359_v48  ;;  %v367_v60 = vand.u32 4294901760, %v366_v49 }
  0x65   : > { %v479_v61 = vand.u32 4294901760, %v478_v51  ;;  %v3292_v62 = vpack.c.bf16 %v313_v52, %v310_v50  ;;  %v3294_v63 = vsub.f32 %v201_v37, %v310_v50  ;;  %v485_v0 = vsub.f32 %v3244_v25, %v4172_v53  ;;  %p3009_p7 = pnand %p3008_p3, %p3002_p6 }
  0x66   : > { %2509 = vmatpush3.bf16.msra.mxu0 %v3270_v45  ;;  %v2532_v1 = vpack.c.bf16 %v367_v60, %v360_v59  ;;  %v492_v2 = vsub.f32 %v3246_v26, %v4170_v54  ;;  %v262_v3 = vand.u32 4294901760, %v185_v55  ;;  %v265_v4 = vand.u32 4294901760, %v186_v56  ;;  %v206_v59 = vld [vmem:[#allocation5 + $0xd8] sm:$0xff] }
  0x67   : > { %v2530_v7 = vpack.c.bf16 %v479_v61, %v472_v57  ;;  %2511 = vmatprep.subr.bf16.mxu0 %v3292_v62  ;;  %v486_v8 = vand.u32 4294901760, %v485_v0  ;;  %v4169_v9 = vand.u32 4294901760, %v3250_v28  ;;  %v4167_v10 = vand.u32 4294901760, %v3260_v38  ;;  %v205_v57 = vld [vmem:[#allocation5 + $0xd0] sm:$0xff]  ;;  %v210_v54 = vld [vmem:[#allocation5 + $0xf8] sm:$0xff] }
  0x68   : > { %v3306_v12 = vsub.f32 %v202_v42, %v313_v52  ;;  %v493_v13 = vand.u32 4294901760, %v492_v2  ;;  %v3308_v16 = vpack.c.bf16 %v265_v4, %v262_v3  ;;  %v3310_v17 = vsub.f32 %v185_v55, %v262_v3 }
  0x69   : > { %2531 = vmatprep.subr.bf16.mxu1 %v2530_v7  ;;  %v373_v18 = vsub.f32 %v3250_v28, %v4169_v9  ;;  %v380_v19 = vsub.f32 %v3260_v38, %v4167_v10  ;;  %v316_v23 = vand.u32 4294901760, %v203_v5  ;;  %v319_v24 = vand.u32 4294901760, %v204_v6  ;;  %v209_v9 = vld [vmem:[#allocation5 + $0xf0] sm:$0xff] }
  0x6a   : > { %2533 = vmatpush3.bf16.msra.mxu1 %v2532_v1  ;;  %v2534_v30 = vpack.c.bf16 %v493_v13, %v486_v8  ;;  %2513 = vmatpush3.bf16.msra.mxu0 %v3308_v16  ;;  %v4165_v33 = vand.u32 4294901760, %v3264_v40  ;;  %v4164_v34 = vand.u32 4294901760, %v3267_v43  ;;  %v268_v37 = vand.u32 4294901760, %v187_v11  ;;  %v189_v1 = vld [vmem:[#allocation5 + $0x50] sm:$0xff] }
  0x6b   : > { %v3321_v42 = vsub.f32 %v186_v56, %v265_v4  ;;  %v374_v47 = vand.u32 4294901760, %v373_v18  ;;  %v381_v48 = vand.u32 4294901760, %v380_v19  ;;  %v3323_v49 = vpack.c.bf16 %v319_v24, %v316_v23  ;;  %v190_v18 = vld [vmem:[#allocation5 + $0x58] sm:$0xff] }
  0x6c   : > { %2535 = vmatprep.subr.bf16.mxu1 %v2534_v30  ;;  %v3325_v50 = vsub.f32 %v203_v5, %v316_v23  ;;  %v499_v51 = vsub.f32 %v3264_v40, %v4165_v33  ;;  %v506_v52 = vsub.f32 %v3267_v43, %v4164_v34  ;;  %v271_v55 = vand.u32 4294901760, %v188_v29 }
  0x6d   : > { %v2536_v56 = vpack.c.bf16 %v381_v48, %v374_v47  ;;  %2515 = vmatprep.subr.bf16.mxu0 %v3323_v49  ;;  %v3334_v60 = vsub.f32 %v204_v6, %v319_v24  ;;  %v4162_v61 = vand.u32 4294901760, %v3272_v46  ;;  %v4160_v0 = vand.u32 4294901760, %v3290_v58 }
  0x6e   : > { %v500_v2 = vand.u32 4294901760, %v499_v51  ;;  %v507_v3 = vand.u32 4294901760, %v506_v52  ;;  %v3338_v4 = vpack.c.bf16 %v271_v55, %v268_v37  ;;  %v3340_v5 = vsub.f32 %v187_v11, %v268_v37 }
  0x6f   : > { %2537 = vmatpush3.bf16.msra.mxu1 %v2536_v56  ;;  %v387_v7 = vsub.f32 %v3272_v46, %v4162_v61  ;;  %v394_v6 = vsub.f32 %v3290_v58, %v4160_v0  ;;  %v322_v8 = vand.u32 4294901760, %v205_v57  ;;  %v325_v13 = vand.u32 4294901760, %v206_v59  ;;  %v208_v0 = vld [vmem:[#allocation5 + $0xe8] sm:$0xff] }
  0x70   : > { %v2538_v19 = vpack.c.bf16 %v507_v3, %v500_v2  ;;  %2517 = vmatpush3.bf16.msra.mxu0 %v3338_v4  ;;  %v4161_v23 = vand.u32 4294901760, %v3294_v63  ;;  %v4163_v11 = vand.u32 4294901760, %v3306_v12  ;;  %v274_v24 = vand.u32 4294901760, %v189_v1  ;;  %v207_v3 = vld [vmem:[#allocation5 + $0xe0] sm:$0xff] }
  0x71   : > { %v3351_v30 = vsub.f32 %v188_v29, %v271_v55  ;;  %v388_v37 = vand.u32 4294901760, %v387_v7  ;;  %v395_v47 = vand.u32 4294901760, %v394_v6  ;;  %v3353_v48 = vpack.c.bf16 %v325_v13, %v322_v8  ;;  %v191_v6 = vld [vmem:[#allocation5 + $0x60] sm:$0xff] }
  0x72   : > { %2539 = vmatprep.subr.bf16.mxu1 %v2538_v19  ;;  %v3355_v51 = vsub.f32 %v205_v57, %v322_v8  ;;  %v513_v52 = vsub.f32 %v3294_v63, %v4161_v23  ;;  %v520_v56 = vsub.f32 %v3306_v12, %v4163_v11  ;;  %v277_v2 = vand.u32 4294901760, %v190_v18  ;;  %v192_v11 = vld [vmem:[#allocation5 + $0x68] sm:$0xff] }
  0x73   : > { %v2540_v29 = vpack.c.bf16 %v395_v47, %v388_v37  ;;  %2519 = vmatprep.subr.bf16.mxu0 %v3353_v48  ;;  %v3364_v55 = vsub.f32 %v206_v59, %v325_v13  ;;  %v4166_v7 = vand.u32 4294901760, %v3310_v17  ;;  %v4168_v57 = vand.u32 4294901760, %v3321_v42 }
  0x74   : > { %v514_v8 = vand.u32 4294901760, %v513_v52  ;;  %v521_v19 = vand.u32 4294901760, %v520_v56  ;;  %v3368_v23 = vpack.c.bf16 %v277_v2, %v274_v24  ;;  %v3370_v61 = vsub.f32 %v189_v1, %v274_v24 }
  0x75   : > { %2541 = vmatpush3.bf16.msra.mxu1 %v2540_v29  ;;  %v401_v37 = vsub.f32 %v3310_v17, %v4166_v7  ;;  %v408_v59 = vsub.f32 %v3321_v42, %v4168_v57  ;;  %v328_v13 = vand.u32 4294901760, %v207_v3  ;;  %v331_v47 = vand.u32 4294901760, %v208_v0 }
  0x76   : > { %4262 = vst [vmem:[#allocation11_spill] sm:$0xff] %v3368_v23  ;;  %v2542_v34 = vpack.c.bf16 %v521_v19, %v514_v8  ;;  %2521 = vmatpush3.bf16.msra.mxu0 %v3368_v23  ;;  %v4171_v52 = vand.u32 4294901760, %v3325_v50  ;;  %v4173_v1 = vand.u32 4294901760, %v3334_v60  ;;  %v280_v24 = vand.u32 4294901760, %v191_v6 }
  0x77   : > { %v3381_v56 = vsub.f32 %v190_v18, %v277_v2  ;;  %v402_v29 = vand.u32 4294901760, %v401_v37  ;;  %v409_v33 = vand.u32 4294901760, %v408_v59  ;;  %v3383_v7 = vpack.c.bf16 %v331_v47, %v328_v13  ;;  %v193_v37 = vld [vmem:[#allocation5 + $0x70] sm:$0xff] }
  0x78   : > { %2543 = vmatprep.subr.bf16.mxu1 %v2542_v34  ;;  %v3385_v10 = vsub.f32 %v207_v3, %v328_v13  ;;  %v527_v8 = vsub.f32 %v3325_v50, %v4171_v52  ;;  %v534_v19 = vsub.f32 %v3334_v60, %v4173_v1  ;;  %v283_v57 = vand.u32 4294901760, %v192_v11  ;;  %v194_v1 = vld [vmem:[#allocation5 + $0x78] sm:$0xff] }
  0x79   : > { %4263 = vst [vmem:[#allocation12_spill] sm:$0xff] %v3383_v7  ;;  %v2544_v18 = vpack.c.bf16 %v409_v33, %v402_v29  ;;  %2523 = vmatprep.subr.bf16.mxu0 %v3383_v7  ;;  %v3394_v2 = vsub.f32 %v208_v0, %v331_v47  ;;  %v4175_v34 = vand.u32 4294901760, %v3340_v5  ;;  %v4177_v3 = vand.u32 4294901760, %v3351_v30 }
  0x7a   : > { %v528_v59 = vand.u32 4294901760, %v527_v8  ;;  %v535_v13 = vand.u32 4294901760, %v534_v19  ;;  %v3398_v52 = vpack.c.bf16 %v283_v57, %v280_v24  ;;  %v3400_v53 = vsub.f32 %v191_v6, %v280_v24 }
  0x7b   : > { %2545 = vmatpush3.bf16.msra.mxu1 %v2544_v18  ;;  %v415_v33 = vsub.f32 %v3340_v5, %v4175_v34  ;;  %v422_v0 = vsub.f32 %v3351_v30, %v4177_v3  ;;  %v334_v47 = vand.u32 4294901760, %v209_v9  ;;  %v337_v29 = vand.u32 4294901760, %v210_v54 }
  0x7c   : > { %4264 = vst [vmem:[#allocation13_spill] sm:$0xff] %v3398_v52  ;;  %v2546_v36 = vpack.c.bf16 %v535_v13, %v528_v59  ;;  %2525 = vmatpush3.bf16.msra.mxu0 %v3398_v52  ;;  %v4182_v8 = vand.u32 4294901760, %v3355_v51  ;;  %v4183_v6 = vand.u32 4294901760, %v3364_v55  ;;  %v286_v24 = vand.u32 4294901760, %v193_v37 }
  0x7d   : > { %v3411_v19 = vsub.f32 %v192_v11, %v283_v57  ;;  %v416_v18 = vand.u32 4294901760, %v415_v33  ;;  %v423_v34 = vand.u32 4294901760, %v422_v0  ;;  %v3413_v35 = vpack.c.bf16 %v337_v29, %v334_v47 }
  0x7e   : > { %2547 = vmatprep.subr.bf16.mxu1 %v2546_v36  ;;  %v3415_v3 = vsub.f32 %v209_v9, %v334_v47  ;;  %v541_v59 = vsub.f32 %v3355_v51, %v4182_v8  ;;  %v548_v13 = vsub.f32 %v3364_v55, %v4183_v6  ;;  %v289_v44 = vand.u32 4294901760, %v194_v1  ;;  %v175_v9 = vld [vmem:[%s3223_s29] sm:$0xff] }
  0x7f   : > { %4265 = vst [vmem:[#allocation14_spill] sm:$0xff] %v3413_v35  ;;  %v2548_v52 = vpack.c.bf16 %v423_v34, %v416_v18  ;;  %2527 = vmatprep.subr.bf16.mxu0 %v3413_v35  ;;  %v3425_v11 = vsub.f32 %v210_v54, %v337_v29  ;;  %v4184_v57 = vand.u32 4294901760, %v3370_v61  ;;  %v4185_v36 = vand.u32 4294901760, %v3381_v56 }
  0x80   : > { %v542_v33 = vand.u32 4294901760, %v541_v59  ;;  %v549_v0 = vand.u32 4294901760, %v548_v13  ;;  %v3430_v47 = vpack.c.bf16 %v289_v44, %v286_v24  ;;  %v3432_v8 = vsub.f32 %v193_v37, %v286_v24 }
  0x81   : > { %2549 = vmatpush3.bf16.msra.mxu1 %v2548_v52  ;;  %v429_v34 = vsub.f32 %v3370_v61, %v4184_v57  ;;  %v436_v54 = vsub.f32 %v3381_v56, %v4185_v36  ;;  %v3440_v29 = vand.u32 4294901760, %v176_v41  ;;  %v4188_v18 = vand.u32 4294901760, %v3385_v10 }
  0x82   : > { %4266 = vst [vmem:[#allocation15_spill] sm:$0xff] %v3430_v47  ;;  %v2550_v6 = vpack.c.bf16 %v549_v0, %v542_v33  ;;  %2529 = vmatpush3.bf16.msra.mxu0 %v3430_v47  ;;  %v4194_v59 = vand.u32 4294901760, %v3394_v2  ;;  %v2562_v52 = vpack.c.bf16 %v3255_v32, %v3253_v31  ;;  %v3447_v37 = vand.u32 4294901760, %v175_v9 }
  0x83   : > { %4267 = vst [vmem:[#allocation16_spill] sm:$0xff] %v3440_v29  ;;  %v430_v24 = vand.u32 4294901760, %v429_v34  ;;  %v437_v13 = vand.u32 4294901760, %v436_v54  ;;  %v3450_v57 = vsub.f32 %v176_v41, %v3440_v29  ;;  %v555_v36 = vsub.f32 %v3385_v10, %v4188_v18  ;;  %580 = vmatprep.mubr.f32.mxu1 %v3440_v29 }
  0x84   : > { %2551 = vmatprep.subr.bf16.mxu1 %v2550_v6  ;;  %v562_v33 = vsub.f32 %v3394_v2, %v4194_v59  ;;  %2563 = vmatprep.subr.bf16.mxu0 %v2562_v52  ;;  %v3460_v0 = vsub.f32 %v175_v9, %v3447_v37  ;;  %v4193_v34 = vand.u32 4294901760, %v3400_v53  ;;  %v4195_v41 = vand.u32 4294901760, %v3411_v19 }
  0x85   : > { %v3464_v54 = vsub.f32 %v194_v1, %v289_v44  ;;  %v2552_v47 = vpack.c.bf16 %v437_v13, %v430_v24  ;;  %v4196_v18 = vand.u32 4294901760, %v3450_v57  ;;  %v556_v35 = vand.u32 4294901760, %v555_v36 }
  0x86   : > { %v563_v29 = vand.u32 4294901760, %v562_v33  ;;  %v347_v6 = vand.u32 4294901760, %v3460_v0  ;;  %v443_v52 = vsub.f32 %v3400_v53, %v4193_v34  ;;  %v450_v9 = vsub.f32 %v3411_v19, %v4195_v41 }
  0x87   : > { %2553 = vmatpush3.bf16.msra.mxu1 %v2552_v47  ;;  %v342_v44 = vsub.f32 %v3450_v57, %v4196_v18  ;;  %v2564_v1 = vpack.c.bf16 %v3239_v21, %v3235_v15  ;;  %v4201_v36 = vand.u32 4294901760, %v3415_v3  ;;  %v4204_v24 = vand.u32 4294901760, %v3425_v11 }
  0x88   : > { %v2554_v13 = vpack.c.bf16 %v563_v29, %v556_v35  ;;  %v348_v33 = vsub.f32 %v3460_v0, %v347_v6  ;;  %v444_v34 = vand.u32 4294901760, %v443_v52  ;;  %v451_v59 = vand.u32 4294901760, %v450_v9 }
  0x89   : > { %v343_v41 = vand.u32 4294901760, %v342_v44  ;;  %v569_v47 = vsub.f32 %v3415_v3, %v4201_v36  ;;  %v576_v18 = vsub.f32 %v3425_v11, %v4204_v24  ;;  %v4203_v7 = vand.u32 4294901760, %v3432_v8 }
  0x8a   : > { %2555 = vmatprep.subr.bf16.mxu1 %v2554_v13  ;;  %v349_v23 = vand.u32 4294901760, %v348_v33  ;;  %v2556_v35 = vpack.c.bf16 %v451_v59, %v444_v34  ;;  %v2566_v29 = vpack.c.bf16 %v3246_v26, %v3244_v25  ;;  %v4202_v52 = vand.u32 4294901760, %v3464_v54 }
  0x8b   : > { %344 = vmatprep.mubr.f32.mxu0 %v343_v41  ;;  %v570_v9 = vand.u32 4294901760, %v569_v47  ;;  %v577_v44 = vand.u32 4294901760, %v576_v18  ;;  %v457_v36 = vsub.f32 %v3432_v8, %v4203_v7  ;;  %v2568_v33 = vpack.c.bf16 %v3260_v38, %v3250_v28 }
  0x8c   : > { %350 = vmatmul.mubr.f32.vlgmr.msra.gmra.mrb[0].mxu0 %v349_v23  ;;  %2557 = vmatpush3.bf16.msra.mxu1 %v2556_v35  ;;  %v464_v13 = vsub.f32 %v3464_v54, %v4202_v52  ;;  %v2570_v41 = vpack.c.bf16 %v3267_v43, %v3264_v40  ;;  %v2572_v23 = vpack.c.bf16 %v3290_v58, %v3272_v46  ;;  %v4269_v35 = vand.u32 4294901760, %v3255_v32 }
  0x8d   : > { %2565 = vmatpush3.bf16.msra.mxu0 %v2564_v1  ;;  %v2558_v59 = vpack.c.bf16 %v577_v44, %v570_v9  ;;  %v458_v34 = vand.u32 4294901760, %v457_v36  ;;  %717 = vmatprep.mubr.f32.mxu0 %v3450_v57  ;;  %v2574_v47 = vpack.c.bf16 %v3306_v12, %v3294_v63  ;;  %v4268_v36 = vand.u32 4294901760, %v3253_v31 }
  0x8e   : > { %2567 = vmatprep.subr.bf16.mxu0 %v2566_v29  ;;  %v465_v18 = vand.u32 4294901760, %v464_v13  ;;  %v4270_v44 = vand.u32 4294901760, %v3235_v15  ;;  %v4271_v29 = vand.u32 4294901760, %v3239_v21  ;;  %v4272_v52 = vand.u32 4294901760, %v3244_v25 }
  0x8f   : > { %2559 = vmatprep.subr.bf16.mxu1 %v2558_v59  ;;  %v2626_v9 = vpack.c.bf16 %v4269_v35, %v4268_v36  ;;  %v4273_v59 = vand.u32 4294901760, %v3246_v26  ;;  %v4274_v24 = vand.u32 4294901760, %v3250_v28  ;;  %v4276_v31 = vand.u32 4294901760, %v3264_v40 }
  0x90   : > { %v2560_v1 = vpack.c.bf16 %v465_v18, %v458_v34  ;;  %v2628_v13 = vpack.c.bf16 %v4271_v29, %v4270_v44  ;;  %v4275_v34 = vand.u32 4294901760, %v3260_v38  ;;  %v4277_v32 = vand.u32 4294901760, %v3267_v43  ;;  %v4291_v29 = vld [vmem:[#allocation16_spill] sm:$0xff] }
  0x91   : > { %v2630_v7 = vpack.c.bf16 %v4273_v59, %v4272_v52  ;;  %2569 = vmatpush3.bf16.msra.mxu0 %v2568_v33  ;;  %v4278_v15 = vand.u32 4294901760, %v3272_v46  ;;  %v4279_v21 = vand.u32 4294901760, %v3290_v58  ;;  %v4280_v25 = vand.u32 4294901760, %v3294_v63  ;;  %v228_v59 = vld [vmem:[#allocation5 + $0x188] sm:$0xff] }
  0x92   : > { %v2632_v18 = vpack.c.bf16 %v4275_v34, %v4274_v24  ;;  %v2634_v36 = vpack.c.bf16 %v4277_v32, %v4276_v31  ;;  %v4281_v26 = vand.u32 4294901760, %v3306_v12  ;;  %2561 = vmatpush3.bf16.msra.mxu1 %v2560_v1  ;;  %2571 = vmatprep.subr.bf16.mxu0 %v2570_v41  ;;  %v4282_v28 = vand.u32 4294901760, %v3310_v17  ;;  %v211_v34 = vld [vmem:[#allocation5 + $0x100] sm:$0xff]  ;;  %v212_v31 = vld [vmem:[#allocation5 + $0x108] sm:$0xff] }
  0x93   : > { %v3533_v35 = vpack.c.bf16 %v4279_v21, %v4278_v15  ;;  %v4283_v38 = vand.u32 4294901760, %v3321_v42  ;;  %v4284_v43 = vand.u32 4294901760, %v3325_v50  ;;  %v4285_v46 = vand.u32 4294901760, %v3334_v60  ;;  %2595 = vmatprep.subr.bf16.mxu1 %v3233_v14  ;;  %v4292_v32 = vld [vmem:[#allocation13_spill] sm:$0xff]  ;;  %v4293_v15 = vld [vmem:[#allocation14_spill] sm:$0xff] }
  0x94   : > { %v3539_v52 = vpack.c.bf16 %v4281_v26, %v4280_v25  ;;  %v4286_v63 = vand.u32 4294901760, %v3340_v5  ;;  %v4287_v12 = vand.u32 4294901760, %v3351_v30  ;;  %v2576_v33 = vpack.c.bf16 %v3321_v42, %v3310_v17 }
  0x95   : > { %v3545_v40 = vpack.c.bf16 %v4283_v38, %v4282_v28  ;;  %v3551_v58 = vpack.c.bf16 %v4285_v46, %v4284_v43  ;;  %582 = vmatmul.mubr.f32.vlgmr.msra.gmra.mrb[0].mxu1 %v3447_v37  ;;  %2573 = vmatpush3.bf16.msra.mxu0 %v2572_v23  ;;  %v2578_v41 = vpack.c.bf16 %v3334_v60, %v3325_v50  ;;  %v4288_v1 = vand.u32 4294901760, %v3450_v57  ;;  %v4289_v57 = vld [vmem:[#allocation11_spill] sm:$0xff]  ;;  %v4290_v23 = vld [vmem:[#allocation12_spill] sm:$0xff] }
  0x96   : > { %v3557_v24 = vpack.c.bf16 %v4287_v12, %v4286_v63  ;;  %2597 = vmatpush3.bf16.msra.mxu1 %v3237_v20  ;;  %2575 = vmatprep.subr.bf16.mxu0 %v2574_v47  ;;  %v2580_v44 = vpack.c.bf16 %v3351_v30, %v3340_v5  ;;  %v2582_v17 = vpack.c.bf16 %v3364_v55, %v3355_v51  ;;  %v227_v47 = vld [vmem:[#allocation5 + $0x180] sm:$0xff]  ;;  %v1157_v25 = vand.u32 4294901760, %v228_v59  ;;  %v4294_v28 = vld [vmem:[#allocation15_spill] sm:$0xff]  ;;  %v214_v63 = vld [vmem:[#allocation5 + $0x118] sm:$0xff] }
  0x97   : > { %2599 = vmatprep.subr.bf16.mxu1 %v3241_v22  ;;  %824 = vmatprep.mubr.f32.mxu1 %v4288_v1  ;;  %v2584_v42 = vpack.c.bf16 %v3381_v56, %v3370_v61  ;;  %v2586_v50 = vpack.c.bf16 %v3394_v2, %v3385_v10  ;;  %v2588_v60 = vpack.c.bf16 %v3411_v19, %v3400_v53  ;;  %v1154_v21 = vand.u32 4294901760, %v227_v47  ;;  %v229_v38 = vld [vmem:[#allocation5 + $0x190] sm:$0xff] }
  0x98   : > { %v2590_v5 = vpack.c.bf16 %v3425_v11, %v3415_v3  ;;  %v2592_v30 = vpack.c.bf16 %v3464_v54, %v3432_v8  ;;  %v1106_v26 = vand.u32 4294901760, %v211_v34  ;;  %v213_v46 = vld [vmem:[#allocation5 + $0x110] sm:$0xff]  ;;  %v3601_v12 = vsub.f32 %v228_v59, %v1157_v25 }
  0x99   : > { %2577 = vmatpush3.bf16.msra.mxu0 %v2576_v33  ;;  %v3599_v43 = vsub.f32 %v227_v47, %v1154_v21 }
  0x9a   : > { %2601 = vmatpush3.bf16.msra.mxu1 %v3248_v27  ;;  %2579 = vmatprep.subr.bf16.mxu0 %v2578_v41  ;;  %v1160_v41 = vand.u32 4294901760, %v229_v38  ;;  %v4214_v59 = vand.u32 4294901760, %v3601_v12 }
  0x9b   : > { %2603 = vmatprep.subr.bf16.mxu1 %v3262_v39 }
  0x9d   : > { %2581 = vmatpush3.bf16.msra.mxu0 %v2580_v44  ;;  %v4297_v44 = vand.u32 4294901760, %v3370_v61 }
  0x9e   : > { %2605 = vmatpush3.bf16.msra.mxu1 %v3270_v45  ;;  %2583 = vmatprep.subr.bf16.mxu0 %v2582_v17  ;;  %v4298_v17 = vand.u32 4294901760, %v3381_v56  ;;  %v4303_v56 = vand.u32 4294901760, %v3415_v3  ;;  %v215_v3 = vld [vmem:[#allocation5 + $0x120] sm:$0xff] }
  0x9f   : > { %2607 = vmatprep.subr.bf16.mxu1 %v3292_v62 }
  0xa1   : > { %2585 = vmatpush3.bf16.msra.mxu0 %v2584_v42  ;;  %v1115_v42 = vand.u32 4294901760, %v214_v63 }
  0xa2   : > { %2609 = vmatpush3.bf16.msra.mxu1 %v3308_v16  ;;  %2587 = vmatprep.subr.bf16.mxu0 %v2586_v50  ;;  %v231_v50 = vld [vmem:[#allocation5 + $0x1a0] sm:$0xff] }
  0xa3   : > { %2611 = vmatprep.subr.bf16.mxu1 %v3323_v49 }
  0xa5   : > { %2589 = vmatpush3.bf16.msra.mxu0 %v2588_v60  ;;  %v232_v60 = vld [vmem:[#allocation5 + $0x1a8] sm:$0xff] }
  0xa6   : > { %2613 = vmatpush3.bf16.msra.mxu1 %v3338_v4  ;;  %2591 = vmatprep.subr.bf16.mxu0 %v2590_v5 }
  0xa7   : > { %2615 = vmatprep.subr.bf16.mxu1 %v3353_v48 }
  0xa9   : > { %2593 = vmatpush3.bf16.msra.mxu0 %v2592_v30  ;;  %v4306_v30 = vand.u32 4294901760, %v3464_v54 }
  0xaa   : > { %2617 = vmatpush3.bf16.msra.mxu1 %v4289_v57  ;;  %2627 = vmatprep.subr.bf16.mxu0 %v2626_v9  ;;  %v1109_v9 = vand.u32 4294901760, %v212_v31 }
  0xab   : > { %2619 = vmatprep.subr.bf16.mxu1 %v4290_v23 }
  0xac   : > { %720 = vmatmul.mubr.f32.vlgmr.msra.gmra.mrb[2].mxu0 %v3460_v0  ;;  %v3605_v33 = vsub.f32 %v212_v31, %v1109_v9  ;;  %v2648_v0 = vpack.c.bf16 %v4298_v17, %v4297_v44  ;;  %v233_v17 = vld [vmem:[#allocation5 + $0x1b0] sm:$0xff] }
  0xad   : > { %2629 = vmatpush3.bf16.msra.mxu0 %v2628_v13  ;;  %994 = vmatprep.mubr.f32.mxu0 %v4291_v29  ;;  %v230_v13 = vld [vmem:[#allocation5 + $0x198] sm:$0xff] }
  0xae   : > { %2621 = vmatpush3.bf16.msra.mxu1 %v4292_v32  ;;  %2631 = vmatprep.subr.bf16.mxu0 %v2630_v7  ;;  %v3603_v7 = vsub.f32 %v211_v34, %v1106_v26  ;;  %v1163_v1 = vand.u32 4294901760, %v230_v13  ;;  %v216_v34 = vld [vmem:[#allocation5 + $0x128] sm:$0xff]  ;;  %v4205_v31 = vand.u32 4294901760, %v3605_v33 }
  0xaf   : > { %2623 = vmatprep.subr.bf16.mxu1 %v4293_v15 }
  0xb0   : > { %v3656_v54 = vpack.c.bf16 %v1163_v1, %v1160_v41 }
  0xb1   : > { %2633 = vmatpush3.bf16.msra.mxu0 %v2632_v18  ;;  %v4295_v18 = vand.u32 4294901760, %v3355_v51 }
  0xb2   : > { %2625 = vmatpush3.bf16.msra.mxu1 %v4294_v28  ;;  %2635 = vmatprep.subr.bf16.mxu0 %v2634_v36  ;;  %v4296_v36 = vand.u32 4294901760, %v3364_v55  ;;  %v1112_v55 = vand.u32 4294901760, %v213_v46  ;;  %4308 = vst [vmem:[#allocation12_spill] sm:$0xff] %v3656_v54 }
  0xb3   : > { %2659 = vmatprep.subr.bf16.mxu1 %v3233_v14 }
  0xb4   : > { %v2646_v14 = vpack.c.bf16 %v4296_v36, %v4295_v18  ;;  %v1169_v18 = vand.u32 4294901760, %v232_v60  ;;  %v3664_v36 = vpack.c.bf16 %v1115_v42, %v1112_v55 }
  0xb5   : > { %828 = vmatmul.mubr.f32.vlgmr.msra.gmra.mrb[2].mxu1 %v347_v6  ;;  %2637 = vmatpush3.bf16.msra.mxu0 %v3533_v35  ;;  %v4299_v6 = vand.u32 4294901760, %v3385_v10  ;;  %v4300_v35 = vand.u32 4294901760, %v3394_v2  ;;  %v4304_v10 = vand.u32 4294901760, %v3425_v11  ;;  %v4305_v2 = vand.u32 4294901760, %v3432_v8 }
  0xb6   : > { %2661 = vmatpush3.bf16.msra.mxu1 %v3237_v20  ;;  %2639 = vmatprep.subr.bf16.mxu0 %v3539_v52  ;;  %v4301_v20 = vand.u32 4294901760, %v3400_v53  ;;  %v4302_v52 = vand.u32 4294901760, %v3411_v19  ;;  %v178_v53 = vld [vmem:[%s3223_s29 + $0x18] sm:$0xff]  ;;  %v3648_v19 = vpack.c.bf16 %v1157_v25, %v1154_v21  ;;  %v4211_v11 = vand.u32 4294901760, %v3603_v7  ;;  %4309 = vst [vmem:[#allocation16_spill] sm:$0xff] %v3664_v36 }
  0xb7   : > { %v3624_v51 = vpack.c.bf16 %v4300_v35, %v4299_v6  ;;  %2663 = vmatprep.subr.bf16.mxu1 %v3241_v22  ;;  %v3637_v5 = vpack.c.bf16 %v4304_v10, %v4303_v56  ;;  %v3643_v47 = vpack.c.bf16 %v4306_v30, %v4305_v2  ;;  %1098 = vmatprep.mubr.f32.mxu1 %v4291_v29  ;;  %v4215_v22 = vand.u32 4294901760, %v3599_v43 }
  0xb8   : > { %v3631_v61 = vpack.c.bf16 %v4302_v52, %v4301_v20  ;;  %v3654_v8 = vpack.c.bf16 %v1109_v9, %v1106_v26  ;;  %v1166_v29 = vand.u32 4294901760, %v231_v50  ;;  %v3660_v21 = vsub.f32 %v229_v38, %v1160_v41  ;;  %v217_v52 = vld [vmem:[#allocation5 + $0x130] sm:$0xff] }
  0xb9   : > { %2641 = vmatpush3.bf16.msra.mxu0 %v3545_v40  ;;  %v3662_v25 = vsub.f32 %v230_v13, %v1163_v1  ;;  %v3666_v44 = vand.u32 4294901760, %v178_v53  ;;  %v3669_v40 = vsub.f32 %v213_v46, %v1112_v55  ;;  %v1333_v26 = vsub.f32 %v3599_v43, %v4215_v22  ;;  %v222_v22 = vld [vmem:[#allocation5 + $0x158] sm:$0xff] }
  0xba   : > { %4307 = vst [vmem:[#allocation11_spill] sm:$0xff] %v3654_v8  ;;  %2665 = vmatpush3.bf16.msra.mxu1 %v3248_v27  ;;  %2643 = vmatprep.subr.bf16.mxu0 %v3551_v58  ;;  %v1118_v9 = vand.u32 4294901760, %v215_v3  ;;  %v1121_v27 = vand.u32 4294901760, %v216_v34  ;;  %v234_v58 = vld [vmem:[#allocation5 + $0x1b8] sm:$0xff]  ;;  %v3674_v38 = vsub.f32 %v214_v63, %v1115_v42  ;;  %v1340_v13 = vsub.f32 %v3601_v12, %v4214_v59 }
  0xbb   : > { %4310 = vst [vmem:[#allocation13_spill] sm:$0xff] %v3666_v44  ;;  %2667 = vmatprep.subr.bf16.mxu1 %v3262_v39  ;;  %v1221_v39 = vsub.f32 %v3603_v7, %v4211_v11  ;;  %v1228_v46 = vsub.f32 %v3605_v33, %v4205_v31  ;;  %v3686_v41 = vpack.c.bf16 %v1169_v18, %v1166_v29  ;;  %v1172_v35 = vand.u32 4294901760, %v233_v17  ;;  %v235_v31 = vld [vmem:[#allocation5 + $0x1c0] sm:$0xff] }
  0xbc   : > { %v3688_v1 = vsub.f32 %v231_v50, %v1166_v29  ;;  %v3690_v63 = vsub.f32 %v232_v60, %v1169_v18  ;;  %v3693_v6 = vsub.f32 %v178_v53, %v3666_v44  ;;  %v1175_v55 = vand.u32 4294901760, %v234_v58 }
  0xbd   : > { %2645 = vmatpush3.bf16.msra.mxu0 %v3557_v24  ;;  %4311 = vst [vmem:[#allocation14_spill] sm:$0xff] %v3686_v41  ;;  %v4209_v42 = vand.u32 4294901760, %v3660_v21  ;;  %v4206_v20 = vand.u32 4294901760, %v3662_v25  ;;  %v218_v24 = vld [vmem:[#allocation5 + $0x138] sm:$0xff]  ;;  %v1334_v50 = vand.u32 4294901760, %v1333_v26  ;;  %v3699_v56 = vpack.c.bf16 %v1121_v27, %v1118_v9 }
  0xbe   : > { %2669 = vmatpush3.bf16.msra.mxu1 %v3270_v45  ;;  %2647 = vmatprep.subr.bf16.mxu0 %v2646_v14  ;;  %v3701_v60 = vsub.f32 %v215_v3, %v1118_v9  ;;  %v3703_v10 = vsub.f32 %v216_v34, %v1121_v27  ;;  %v1341_v2 = vand.u32 4294901760, %v1340_v13  ;;  %v1222_v45 = vand.u32 4294901760, %v1221_v39  ;;  %v236_v27 = vld [vmem:[#allocation5 + $0x1c8] sm:$0xff] }
  0xbf   : > { %2671 = vmatprep.subr.bf16.mxu1 %v3292_v62  ;;  %4312 = vst [vmem:[#allocation15_spill] sm:$0xff] %v3699_v56  ;;  %v1229_v14 = vand.u32 4294901760, %v1228_v46  ;;  %v4208_v30 = vand.u32 4294901760, %v3669_v40  ;;  %v1124_v53 = vand.u32 4294901760, %v217_v52  ;;  %v1127_v29 = vand.u32 4294901760, %v218_v24 }
  0xc0   : > { %v4207_v18 = vand.u32 4294901760, %v3674_v38  ;;  %v4218_v62 = vand.u32 4294901760, %v3693_v6  ;;  %v3710_v3 = vpack.c.bf16 %v1175_v55, %v1172_v35  ;;  %v1347_v34 = vsub.f32 %v3660_v21, %v4209_v42 }
  0xc1   : > { %2649 = vmatpush3.bf16.msra.mxu0 %v2648_v0  ;;  %v1354_v0 = vsub.f32 %v3662_v25, %v4206_v20  ;;  %v3719_v26 = vsub.f32 %v233_v17, %v1172_v35  ;;  %v3721_v9 = vsub.f32 %v234_v58, %v1175_v55  ;;  %v3725_v13 = vpack.c.bf16 %v1341_v2, %v1334_v50 }
  0xc2   : > { %2673 = vmatpush3.bf16.msra.mxu1 %v3308_v16  ;;  %2651 = vmatprep.subr.bf16.mxu0 %v3624_v51  ;;  %4313 = vst [vmem:[#allocation17_spill] sm:$0xff] %v3710_v3  ;;  %v4210_v16 = vand.u32 4294901760, %v3688_v1  ;;  %v4213_v51 = vand.u32 4294901760, %v3690_v63  ;;  %v3727_v39 = vpack.c.bf16 %v1229_v14, %v1222_v45  ;;  %v1235_v46 = vsub.f32 %v3669_v40, %v4208_v30 }
  0xc3   : > { %2675 = vmatprep.subr.bf16.mxu1 %v3323_v49  ;;  %v1178_v20 = vand.u32 4294901760, %v235_v31  ;;  %v3733_v49 = vpack.c.bf16 %v1127_v29, %v1124_v53  ;;  %v1242_v17 = vsub.f32 %v3674_v38, %v4207_v18  ;;  %v4212_v58 = vand.u32 4294901760, %v3701_v60 }
  0xc4   : > { %v1204_v35 = vsub.f32 %v3693_v6, %v4218_v62  ;;  %v1348_v55 = vand.u32 4294901760, %v1347_v34  ;;  %v1355_v50 = vand.u32 4294901760, %v1354_v0  ;;  %v1181_v2 = vand.u32 4294901760, %v236_v27  ;;  %v220_v0 = vld [vmem:[#allocation5 + $0x148] sm:$0xff] }
  0xc5   : > { %2653 = vmatpush3.bf16.msra.mxu0 %v3631_v61  ;;  %4314 = vst [vmem:[#allocation18_spill] sm:$0xff] %v3733_v49  ;;  %v219_v61 = vld [vmem:[#allocation5 + $0x140] sm:$0xff]  ;;  %v4217_v45 = vand.u32 4294901760, %v3703_v10  ;;  %v3746_v14 = vsub.f32 %v217_v52, %v1124_v53  ;;  %v3748_v18 = vsub.f32 %v218_v24, %v1127_v29  ;;  %v1361_v30 = vsub.f32 %v3688_v1, %v4210_v16  ;;  %v237_v29 = vld [vmem:[#allocation5 + $0x1d0] sm:$0xff]  ;;  %v238_v16 = vld [vmem:[#allocation5 + $0x1d8] sm:$0xff] }
  0xc6   : > { %2677 = vmatpush3.bf16.msra.mxu1 %v3338_v4  ;;  %2655 = vmatprep.subr.bf16.mxu0 %v3637_v5  ;;  %v1368_v4 = vsub.f32 %v3690_v63, %v4213_v51  ;;  %v1236_v5 = vand.u32 4294901760, %v1235_v46  ;;  %v3756_v34 = vsub.f32 %v235_v31, %v1178_v20  ;;  %v4216_v42 = vand.u32 4294901760, %v3719_v26 }
  0xc7   : > { %2679 = vmatprep.subr.bf16.mxu1 %v3353_v48  ;;  %v4219_v48 = vand.u32 4294901760, %v3721_v9  ;;  %v1243_v52 = vand.u32 4294901760, %v1242_v17  ;;  %v1130_v24 = vand.u32 4294901760, %v219_v61  ;;  %v1249_v53 = vsub.f32 %v3701_v60, %v4212_v58 }
  0xc8   : > { %v1205_v11 = vand.u32 4294901760, %v1204_v35  ;;  %v3766_v31 = vpack.c.bf16 %v1355_v50, %v1348_v55  ;;  %v3768_v46 = vpack.c.bf16 %v1181_v2, %v1178_v20  ;;  %v3774_v17 = vsub.f32 %v236_v27, %v1181_v2  ;;  %v221_v35 = vld [vmem:[#allocation5 + $0x150] sm:$0xff] }
  0xc9   : > { %2657 = vmatpush3.bf16.msra.mxu0 %v3643_v47  ;;  %v1256_v47 = vsub.f32 %v3703_v10, %v4217_v45  ;;  %v1362_v58 = vand.u32 4294901760, %v1361_v30  ;;  %v1369_v51 = vand.u32 4294901760, %v1368_v4  ;;  %v1133_v59 = vand.u32 4294901760, %v220_v0 }
  0xca   : > { %2681 = vmatpush3.bf16.msra.mxu1 %v4289_v57  ;;  %2691 = vmatprep.subr.bf16.mxu0 %v3648_v19  ;;  %4315 = vst [vmem:[#allocation19_spill] sm:$0xff] %v3768_v46  ;;  %v1184_v57 = vand.u32 4294901760, %v237_v29  ;;  %v1187_v55 = vand.u32 4294901760, %v238_v16  ;;  %v1375_v20 = vsub.f32 %v3719_v26, %v4216_v42  ;;  %v1382_v50 = vsub.f32 %v3721_v9, %v4219_v48  ;;  %v239_v48 = vld [vmem:[#allocation5 + $0x1e0] sm:$0xff] }
  0xcb   : > { %2683 = vmatprep.subr.bf16.mxu1 %v4290_v23  ;;  %v3784_v23 = vpack.c.bf16 %v1243_v52, %v1236_v5  ;;  %v3786_v30 = vsub.f32 %v219_v61, %v1130_v24  ;;  %v1250_v27 = vand.u32 4294901760, %v1249_v53  ;;  %v1257_v4 = vand.u32 4294901760, %v1256_v47  ;;  %v240_v53 = vld [vmem:[#allocation5 + $0x1e8] sm:$0xff] }
  0xcc   : > { %996 = vmatmul.mubr.f32.vlgmr.msra.gmra.mrb[4].mxu0 %v3447_v37  ;;  %v1136_v42 = vand.u32 4294901760, %v221_v35  ;;  %v1139_v45 = vand.u32 4294901760, %v222_v22  ;;  %v4226_v62 = vand.u32 4294901760, %v3748_v18  ;;  %v3793_v5 = vpack.c.bf16 %v1369_v51, %v1362_v58 }
  0xcd   : > { %2693 = vmatpush3.bf16.msra.mxu0 %v3654_v8  ;;  %1206 = vmatprep.mubr.f32.mxu0 %v1205_v11  ;;  %v3795_v61 = vpack.c.bf16 %v1133_v59, %v1130_v24  ;;  %v3797_v52 = vsub.f32 %v220_v0, %v1133_v59  ;;  %v4224_v11 = vand.u32 4294901760, %v3756_v34  ;;  %v1376_v2 = vand.u32 4294901760, %v1375_v20  ;;  %v3803_v8 = vld [vmem:[#allocation5 + $0x160] sm:$0xff] }
  0xce   : > { %2685 = vmatpush3.bf16.msra.mxu1 %v4292_v32  ;;  %2695 = vmatprep.subr.bf16.mxu0 %v3656_v54  ;;  %v3800_v32 = vpack.c.bf16 %v1187_v55, %v1184_v57  ;;  %v1383_v47 = vand.u32 4294901760, %v1382_v50  ;;  %v4225_v54 = vand.u32 4294901760, %v3774_v17  ;;  %v3808_v51 = vsub.f32 %v238_v16, %v1187_v55  ;;  %v3830_v50 = vld [vmem:[#allocation5 + $0x168] sm:$0xff] }
  0xcf   : > { %2687 = vmatprep.subr.bf16.mxu1 %v4293_v15  ;;  %v3806_v15 = vsub.f32 %v237_v29, %v1184_v57  ;;  %v4319_v59 = vand.u32 4294901760, %v3746_v14  ;;  %v1190_v0 = vand.u32 4294901760, %v239_v48  ;;  %v3815_v24 = vpack.c.bf16 %v1257_v4, %v1250_v27 }
  0xd0   : > { %4316 = vst [vmem:[#allocation20_spill] sm:$0xff] %v3800_v32  ;;  %4318 = vst [vmem:[#allocation22_spill] sm:$0xff] %v3808_v51  ;;  %v3817_v20 = vpack.c.bf16 %v1139_v45, %v1136_v42  ;;  %v1270_v29 = vsub.f32 %v3748_v18, %v4226_v62  ;;  %v1193_v57 = vand.u32 4294901760, %v240_v53  ;;  %v3823_v16 = vsub.f32 %v221_v35, %v1136_v42 }
  0xd1   : > { %2697 = vmatpush3.bf16.msra.mxu0 %v3664_v36  ;;  %4317 = vst [vmem:[#allocation21_spill] sm:$0xff] %v3806_v15  ;;  %v1263_v58 = vsub.f32 %v3746_v14, %v4319_v59  ;;  %v3825_v55 = vsub.f32 %v222_v22, %v1139_v45  ;;  %v4227_v27 = vand.u32 4294901760, %v3803_v8  ;;  %v2734_v4 = vpack.c.bf16 %v1383_v47, %v1376_v2  ;;  %v3838_v22 = vld [vmem:[#allocation5 + $0x1f0] sm:$0xff]  ;;  %v3840_v45 = vld [vmem:[#allocation5 + $0x1f8] sm:$0xff] }
  0xd2   : > { %2689 = vmatpush3.bf16.msra.mxu1 %v4294_v28  ;;  %2699 = vmatprep.subr.bf16.mxu0 %v3686_v41  ;;  %v1389_v28 = vsub.f32 %v3756_v34, %v4224_v11  ;;  %v1396_v59 = vsub.f32 %v3774_v17, %v4225_v54  ;;  %v3844_v11 = vsub.f32 %v239_v48, %v1190_v0  ;;  %v177_v54 = vld [vmem:[%s3223_s29 + $0x10] sm:$0xff]  ;;  %v1271_v62 = vand.u32 4294901760, %v1270_v29 }
  0xd3   : > { %2723 = vmatprep.subr.bf16.mxu1 %v3725_v13  ;;  %v1264_v35 = vand.u32 4294901760, %v1263_v58  ;;  %v3851_v42 = vpack.c.bf16 %v1193_v57, %v1190_v0  ;;  %v3853_v13 = vsub.f32 %v240_v53, %v1193_v57  ;;  %v3860_v58 = vsub.f32 %v3803_v8, %v4227_v27  ;;  %v3864_v2 = vld [vmem:[#allocation5 + $0x170] sm:$0xff]  ;;  %v3866_v0 = vld [vmem:[#allocation5 + $0x178] sm:$0xff] }
  0xd4   : > { %v1390_v48 = vand.u32 4294901760, %v1389_v28  ;;  %v1196_v47 = vand.u32 4294901760, %v3838_v22  ;;  %v1397_v53 = vand.u32 4294901760, %v1396_v59  ;;  %v4320_v29 = vand.u32 4294901760, %v3786_v30 }
  0xd5   : > { %1100 = vmatmul.mubr.f32.vlgmr.msra.gmra.mrb[4].mxu1 %v3447_v37  ;;  %2701 = vmatpush3.bf16.msra.mxu0 %v3699_v56  ;;  %v1145_v37 = vand.u32 4294901760, %v3830_v50  ;;  %v4321_v57 = vand.u32 4294901760, %v3797_v52  ;;  %v3875_v27 = vand.u32 4294901760, %v177_v54  ;;  %v4323_v41 = vand.u32 4294901760, %v3808_v51 }
  0xd6   : > { %2725 = vmatpush3.bf16.msra.mxu1 %v3727_v39  ;;  %2703 = vmatprep.subr.bf16.mxu0 %v3710_v3  ;;  %v1199_v39 = vand.u32 4294901760, %v3840_v45  ;;  %v4322_v3 = vand.u32 4294901760, %v3806_v15 }
  0xd7   : > { %2727 = vmatprep.subr.bf16.mxu1 %v3766_v31  ;;  %1442 = vmatprep.mubr.f32.mxu1 %v3666_v44  ;;  %v1277_v31 = vsub.f32 %v3786_v30, %v4320_v29  ;;  %v1284_v28 = vsub.f32 %v3797_v52, %v4321_v57  ;;  %v1410_v59 = vsub.f32 %v3808_v51, %v4323_v41  ;;  %v4248_v29 = vand.u32 4294901760, %v3853_v13 }
  0xd8   : > { %v1403_v56 = vsub.f32 %v3806_v15, %v4322_v3  ;;  %v2736_v57 = vpack.c.bf16 %v1271_v62, %v1264_v35  ;;  %v3889_v36 = vsub.f32 %v3830_v50, %v1145_v37  ;;  %v1151_v3 = vand.u32 4294901760, %v3866_v0 }
  0xd9   : > { %2705 = vmatpush3.bf16.msra.mxu0 %v3733_v49  ;;  %v1148_v49 = vand.u32 4294901760, %v3864_v2  ;;  %v3895_v41 = vsub.f32 %v3838_v22, %v1196_v47  ;;  %v3898_v44 = vsub.f32 %v3840_v45, %v1199_v39  ;;  %v2738_v62 = vpack.c.bf16 %v1397_v53, %v1390_v48 }
  0xda   : > { %2729 = vmatpush3.bf16.msra.mxu1 %v3784_v23  ;;  %2707 = vmatprep.subr.bf16.mxu0 %v3768_v46  ;;  %v1278_v35 = vand.u32 4294901760, %v1277_v31  ;;  %v1285_v50 = vand.u32 4294901760, %v1284_v28  ;;  %v3903_v46 = vsub.f32 %v177_v54, %v3875_v27  ;;  %v1404_v51 = vand.u32 4294901760, %v1403_v56 }
  0xdb   : > { %2731 = vmatprep.subr.bf16.mxu1 %v3793_v5  ;;  %v1411_v5 = vand.u32 4294901760, %v1410_v59  ;;  %v4324_v22 = vand.u32 4294901760, %v3823_v16  ;;  %v4325_v45 = vand.u32 4294901760, %v3825_v55  ;;  %v3915_v48 = vsub.f32 %v3864_v2, %v1148_v49 }
  0xdc   : > { %v3918_v54 = vsub.f32 %v3866_v0, %v1151_v3  ;;  %v4326_v31 = vand.u32 4294901760, %v3844_v11  ;;  %v1430_v59 = vand.u32 4294901760, %v3895_v41  ;;  %v4327_v0 = vand.u32 4294901760, %v3803_v8 }
  0xdd   : > { %2709 = vmatpush3.bf16.msra.mxu0 %v3795_v61  ;;  %v1291_v15 = vsub.f32 %v3823_v16, %v4324_v22  ;;  %v1298_v23 = vsub.f32 %v3825_v55, %v4325_v45  ;;  %v3934_v45 = vpack.c.bf16 %v1199_v39, %v1196_v47  ;;  %v2740_v53 = vpack.c.bf16 %v1285_v50, %v1278_v35 }
  0xde   : > { %2733 = vmatpush3.bf16.msra.mxu1 %v3815_v24  ;;  %2711 = vmatprep.subr.bf16.mxu0 %v3800_v32  ;;  %v1417_v28 = vsub.f32 %v3844_v11, %v4326_v31  ;;  %v1424_v24 = vsub.f32 %v3853_v13, %v4248_v29  ;;  %v3932_v22 = vpack.c.bf16 %v1145_v37, %v4327_v0  ;;  %v4328_v29 = vand.u32 4294901760, %v3860_v58 }
  0xdf   : > { %2735 = vmatprep.subr.bf16.mxu1 %v2734_v4  ;;  %v1209_v4 = vand.u32 4294901760, %v3903_v46  ;;  %v2742_v31 = vpack.c.bf16 %v1411_v5, %v1404_v51  ;;  %v1292_v56 = vand.u32 4294901760, %v1291_v15  ;;  %v1299_v32 = vand.u32 4294901760, %v1298_v23 }
  0xe0   : > { %v1305_v2 = vsub.f32 %v3860_v58, %v4328_v29  ;;  %v4329_v8 = vand.u32 4294901760, %v3889_v36  ;;  %v4249_v37 = vand.u32 4294901760, %v3915_v48  ;;  %v4250_v39 = vand.u32 4294901760, %v3918_v54 }
  0xe1   : > { %2713 = vmatpush3.bf16.msra.mxu0 %v3817_v20  ;;  %v1418_v35 = vand.u32 4294901760, %v1417_v28  ;;  %v1425_v51 = vand.u32 4294901760, %v1424_v24  ;;  %v1431_v15 = vsub.f32 %v3895_v41, %v1430_v59  ;;  %v1210_v29 = vsub.f32 %v3903_v46, %v1209_v4 }
  0xe2   : > { %2737 = vmatpush3.bf16.msra.mxu1 %v2736_v57  ;;  %2715 = vmatprep.subr.bf16.mxu0 %v3851_v42  ;;  %v1312_v47 = vsub.f32 %v3889_v36, %v4329_v8  ;;  %v4330_v57 = vand.u32 4294901760, %v3898_v44  ;;  %v3957_v50 = vpack.c.bf16 %v1151_v3, %v1148_v49  ;;  %v2744_v5 = vpack.c.bf16 %v1299_v32, %v1292_v56 }
  0xe3   : > { %2739 = vmatprep.subr.bf16.mxu1 %v2738_v62  ;;  %v2754_v62 = vpack.c.bf16 %v3601_v12, %v3599_v43  ;;  %v1306_v28 = vand.u32 4294901760, %v1305_v2  ;;  %v1319_v0 = vsub.f32 %v3915_v48, %v4249_v37  ;;  %v1326_v8 = vsub.f32 %v3918_v54, %v4250_v39 }
  0xe4   : > { %v1438_v23 = vsub.f32 %v3898_v44, %v4330_v57  ;;  %v1313_v24 = vand.u32 4294901760, %v1312_v47  ;;  %v2746_v49 = vpack.c.bf16 %v1425_v51, %v1418_v35  ;;  %v1432_v3 = vand.u32 4294901760, %v1431_v15 }
  0xe5   : > { %2717 = vmatpush3.bf16.msra.mxu0 %v3932_v22  ;;  %v1211_v56 = vand.u32 4294901760, %v1210_v29  ;;  %v2758_v47 = vpack.c.bf16 %v3662_v25, %v3660_v21  ;;  %v1320_v57 = vand.u32 4294901760, %v1319_v0  ;;  %v1327_v37 = vand.u32 4294901760, %v1326_v8  ;;  %v4331_v29 = vld [vmem:[#allocation11_spill] sm:$0xff]  ;;  %v4335_v0 = vld [vmem:[#allocation21_spill] sm:$0xff]  ;;  %v4336_v8 = vld [vmem:[#allocation22_spill] sm:$0xff] }
  0xe6   : > { %2741 = vmatpush3.bf16.msra.mxu1 %v2740_v53  ;;  %2719 = vmatprep.subr.bf16.mxu0 %v3934_v45  ;;  %v1439_v32 = vand.u32 4294901760, %v1438_v23  ;;  %v2756_v53 = vpack.c.bf16 %v3605_v33, %v3603_v7  ;;  %v2748_v2 = vpack.c.bf16 %v1313_v24, %v1306_v28  ;;  %v2762_v51 = vpack.c.bf16 %v3690_v63, %v3688_v1  ;;  %v4334_v24 = vld [vmem:[#allocation16_spill] sm:$0xff] }
  0xe7   : > { %2743 = vmatprep.subr.bf16.mxu1 %v2742_v31  ;;  %v2760_v31 = vpack.c.bf16 %v3674_v38, %v3669_v40  ;;  %v2752_v35 = vpack.c.bf16 %v1327_v37, %v1320_v57  ;;  %v2764_v15 = vpack.c.bf16 %v3703_v10, %v3701_v60  ;;  %v2766_v23 = vpack.c.bf16 %v3721_v9, %v3719_v26 }
  0xe8   : > { %v2750_v39 = vpack.c.bf16 %v1439_v32, %v1432_v3  ;;  %v2768_v37 = vpack.c.bf16 %v3748_v18, %v3746_v14  ;;  %v2772_v28 = vpack.c.bf16 %v3797_v52, %v3786_v30  ;;  %v4337_v3 = vld [vmem:[#allocation14_spill] sm:$0xff]  ;;  %v2776_v32 = vpack.c.bf16 %v3825_v55, %v3823_v16 }
  0xe9   : > { %2721 = vmatpush3.bf16.msra.mxu0 %v3957_v50  ;;  %v2782_v57 = vpack.c.bf16 %v3898_v44, %v3895_v41 }
  0xea   : > { %2745 = vmatpush3.bf16.msra.mxu1 %v2744_v5  ;;  %2755 = vmatprep.subr.bf16.mxu0 %v2754_v62  ;;  %v4332_v5 = vld [vmem:[#allocation12_spill] sm:$0xff]  ;;  %v4333_v62 = vand.u32 4294901760, %v3693_v6 }
  0xeb   : > { %2747 = vmatprep.subr.bf16.mxu1 %v2746_v49  ;;  %v2774_v49 = vpack.c.bf16 %v4336_v8, %v4335_v0 }
  0xec   : > { %1212 = vmatmul.mubr.f32.vlgmr.msra.gmra.mrb[6].mxu0 %v1211_v56  ;;  %v4338_v56 = vld [vmem:[#allocation15_spill] sm:$0xff] }
  0xed   : > { %2757 = vmatpush3.bf16.msra.mxu0 %v2756_v53  ;;  %1579 = vmatprep.mubr.f32.mxu0 %v3693_v6  ;;  %v2778_v6 = vpack.c.bf16 %v3853_v13, %v3844_v11  ;;  %v4339_v53 = vld [vmem:[#allocation17_spill] sm:$0xff] }
  0xee   : > { %2749 = vmatpush3.bf16.msra.mxu1 %v2748_v2  ;;  %2759 = vmatprep.subr.bf16.mxu0 %v2758_v47  ;;  %v2780_v2 = vpack.c.bf16 %v3889_v36, %v3860_v58  ;;  %v4340_v47 = vld [vmem:[#allocation18_spill] sm:$0xff] }
  0xef   : > { %2751 = vmatprep.subr.bf16.mxu1 %v2750_v39  ;;  %v2770_v39 = vpack.c.bf16 %v3774_v17, %v3756_v34 }
  0xf1   : > { %2761 = vmatpush3.bf16.msra.mxu0 %v2760_v31  ;;  %v4341_v31 = vld [vmem:[#allocation19_spill] sm:$0xff] }
  0xf2   : > { %2753 = vmatpush3.bf16.msra.mxu1 %v2752_v35  ;;  %2763 = vmatprep.subr.bf16.mxu0 %v2762_v51  ;;  %v2784_v35 = vpack.c.bf16 %v3918_v54, %v3915_v48  ;;  %v4342_v51 = vand.u32 4294901760, %v3599_v43  ;;  %v4349_v43 = vand.u32 4294901760, %v3669_v40  ;;  %v4355_v40 = vand.u32 4294901760, %v3703_v10 }
  0xf3   : > { %2787 = vmatprep.subr.bf16.mxu1 %v3648_v19  ;;  %v4360_v10 = vand.u32 4294901760, %v3756_v34  ;;  %v4365_v34 = vand.u32 4294901760, %v4336_v8  ;;  %v4371_v8 = vand.u32 4294901760, %v3889_v36 }
  0xf5   : > { %1444 = vmatmul.mubr.f32.vlgmr.msra.gmra.mrb[6].mxu1 %v3875_v27  ;;  %2765 = vmatpush3.bf16.msra.mxu0 %v2764_v15  ;;  %v4343_v15 = vand.u32 4294901760, %v3601_v12  ;;  %v4350_v12 = vand.u32 4294901760, %v3674_v38  ;;  %v4356_v38 = vand.u32 4294901760, %v3719_v26  ;;  %v4361_v26 = vand.u32 4294901760, %v3774_v17 }
  0xf6   : > { %2789 = vmatpush3.bf16.msra.mxu1 %v4331_v29  ;;  %2767 = vmatprep.subr.bf16.mxu0 %v2766_v23  ;;  %v4366_v17 = vand.u32 4294901760, %v3823_v16  ;;  %v4372_v16 = vand.u32 4294901760, %v3898_v44 }
  0xf7   : > { %2791 = vmatprep.subr.bf16.mxu1 %v4332_v5  ;;  %1686 = vmatprep.mubr.f32.mxu1 %v4333_v62  ;;  %v2818_v23 = vpack.c.bf16 %v4343_v15, %v4342_v51  ;;  %v4346_v62 = vand.u32 4294901760, %v3605_v33  ;;  %v4351_v33 = vld [vmem:[#allocation13_spill] sm:$0xff]  ;;  %v4357_v51 = vand.u32 4294901760, %v3721_v9  ;;  %v2834_v9 = vpack.c.bf16 %v4361_v26, %v4360_v10 }
  0xf9   : > { %2769 = vmatpush3.bf16.msra.mxu0 %v2768_v37  ;;  %v4344_v37 = vld [vmem:[#allocation20_spill] sm:$0xff]  ;;  %v2830_v15 = vpack.c.bf16 %v4357_v51, %v4356_v38 }
  0xfa   : > { %2793 = vmatpush3.bf16.msra.mxu1 %v4334_v24  ;;  %2771 = vmatprep.subr.bf16.mxu0 %v2770_v39  ;;  %v4345_v39 = vand.u32 4294901760, %v3603_v7  ;;  %v2824_v7 = vpack.c.bf16 %v4350_v12, %v4349_v43 }
  0xfb   : > { %2795 = vmatprep.subr.bf16.mxu1 %v4337_v3 }
  0xfd   : > { %2773 = vmatpush3.bf16.msra.mxu0 %v2772_v28  ;;  %v2820_v28 = vpack.c.bf16 %v4346_v62, %v4345_v39 }
  0xfe   : > { %2797 = vmatpush3.bf16.msra.mxu1 %v4338_v56  ;;  %2775 = vmatprep.subr.bf16.mxu0 %v2774_v49  ;;  %v4347_v49 = vand.u32 4294901760, %v3660_v21  ;;  %v4352_v21 = vand.u32 4294901760, %v3688_v1  ;;  %v4358_v1 = vand.u32 4294901760, %v3746_v14  ;;  %v4363_v14 = vand.u32 4294901760, %v3797_v52 }
  0xff   : > { %2799 = vmatprep.subr.bf16.mxu1 %v4339_v53  ;;  %v4369_v52 = vand.u32 4294901760, %v3853_v13  ;;  %v4374_v13 = vand.u32 4294901760, %v3918_v54 }
 0x101   : > { %2777 = vmatpush3.bf16.msra.mxu0 %v2776_v32  ;;  %v4348_v32 = vand.u32 4294901760, %v3662_v25  ;;  %v4353_v25 = vand.u32 4294901760, %v3690_v63  ;;  %v4359_v63 = vand.u32 4294901760, %v3748_v18  ;;  %v4364_v18 = vand.u32 4294901760, %v4335_v0 }
 0x102   : > { %2801 = vmatpush3.bf16.msra.mxu1 %v4340_v47  ;;  %2779 = vmatprep.subr.bf16.mxu0 %v2778_v6  ;;  %v4370_v0 = vand.u32 4294901760, %v3860_v58 }
 0x103   : > { %2803 = vmatprep.subr.bf16.mxu1 %v4341_v31  ;;  %v2822_v6 = vpack.c.bf16 %v4348_v32, %v4347_v49 }
 0x105   : > { %2781 = vmatpush3.bf16.msra.mxu0 %v2780_v2  ;;  %v2826_v2 = vpack.c.bf16 %v4353_v25, %v4352_v21 }
 0x106   : > { %2805 = vmatpush3.bf16.msra.mxu1 %v3795_v61  ;;  %2783 = vmatprep.subr.bf16.mxu0 %v2782_v57  ;;  %v4354_v57 = vand.u32 4294901760, %v3701_v60  ;;  %v2832_v60 = vpack.c.bf16 %v4359_v63, %v4358_v1 }
 0x107   : > { %2807 = vmatprep.subr.bf16.mxu1 %v4344_v37 }
 0x109   : > { %2785 = vmatpush3.bf16.msra.mxu0 %v2784_v35  ;;  %v2828_v35 = vpack.c.bf16 %v4355_v40, %v4354_v57 }
 0x10a   : > { %2809 = vmatpush3.bf16.msra.mxu1 %v3817_v20  ;;  %2819 = vmatprep.subr.bf16.mxu0 %v2818_v23 }
 0x10b   : > { %2811 = vmatprep.subr.bf16.mxu1 %v3851_v42 }
 0x10c   : > { %1582 = vmatmul.mubr.f32.vlgmr.msra.gmra.mrb[8].mxu0 %v3903_v46 }
 0x10d   : > { %2821 = vmatpush3.bf16.msra.mxu0 %v2820_v28  ;;  %1856 = vmatprep.mubr.f32.mxu0 %v4351_v33 }
 0x10e   : > { %2813 = vmatpush3.bf16.msra.mxu1 %v3932_v22  ;;  %2823 = vmatprep.subr.bf16.mxu0 %v2822_v6 }
 0x10f   : > { %2815 = vmatprep.subr.bf16.mxu1 %v3934_v45 }
 0x111   : > { %2825 = vmatpush3.bf16.msra.mxu0 %v2824_v7 }
 0x112   : > { %2817 = vmatpush3.bf16.msra.mxu1 %v3957_v50  ;;  %2827 = vmatprep.subr.bf16.mxu0 %v2826_v2 }
 0x113   : > { %2851 = vmatprep.subr.bf16.mxu1 %v3648_v19  ;;  %v4362_v19 = vand.u32 4294901760, %v3786_v30  ;;  %v4368_v30 = vand.u32 4294901760, %v3844_v11  ;;  %v4373_v11 = vand.u32 4294901760, %v3915_v48 }
 0x115   : > { %1690 = vmatmul.mubr.f32.vlgmr.msra.gmra.mrb[8].mxu1 %v1209_v4  ;;  %2829 = vmatpush3.bf16.msra.mxu0 %v2828_v35  ;;  %v2836_v46 = vpack.c.bf16 %v4363_v14, %v4362_v19  ;;  %v2838_v4 = vpack.c.bf16 %v4365_v34, %v4364_v18 }
 0x116   : > { %2853 = vmatpush3.bf16.msra.mxu1 %v4331_v29  ;;  %2831 = vmatprep.subr.bf16.mxu0 %v2830_v15  ;;  %v4367_v29 = vand.u32 4294901760, %v3825_v55  ;;  %v2846_v55 = vpack.c.bf16 %v4372_v16, %v1430_v59 }
 0x117   : > { %2855 = vmatprep.subr.bf16.mxu1 %v4332_v5  ;;  %1960 = vmatprep.mubr.f32.mxu1 %v4351_v33 }
 0x118   : > { %v2840_v5 = vpack.c.bf16 %v4367_v29, %v4366_v17 }
 0x119   : > { %2833 = vmatpush3.bf16.msra.mxu0 %v2832_v60 }
 0x11a   : > { %2857 = vmatpush3.bf16.msra.mxu1 %v4334_v24  ;;  %2835 = vmatprep.subr.bf16.mxu0 %v2834_v9  ;;  %v2842_v24 = vpack.c.bf16 %v4369_v52, %v4368_v30 }
 0x11b   : > { %2859 = vmatprep.subr.bf16.mxu1 %v4337_v3  ;;  %v2844_v3 = vpack.c.bf16 %v4371_v8, %v4370_v0 }
 0x11d   : > { %2837 = vmatpush3.bf16.msra.mxu0 %v2836_v46 }
 0x11e   : > { %2861 = vmatpush3.bf16.msra.mxu1 %v4338_v56  ;;  %2839 = vmatprep.subr.bf16.mxu0 %v2838_v4  ;;  %v2848_v56 = vpack.c.bf16 %v4374_v13, %v4373_v11 }
 0x11f   : > { %2863 = vmatprep.subr.bf16.mxu1 %v4339_v53 }
 0x121   : > { %2841 = vmatpush3.bf16.msra.mxu0 %v2840_v5 }
 0x122   : > { %2865 = vmatpush3.bf16.msra.mxu1 %v4340_v47  ;;  %2843 = vmatprep.subr.bf16.mxu0 %v2842_v24 }
 0x123   : > { %2867 = vmatprep.subr.bf16.mxu1 %v4341_v31 }
 0x125   : > { %2845 = vmatpush3.bf16.msra.mxu0 %v2844_v3 }
 0x126   : > { %2869 = vmatpush3.bf16.msra.mxu1 %v3795_v61  ;;  %2847 = vmatprep.subr.bf16.mxu0 %v2846_v55 }
 0x127   : > { %2871 = vmatprep.subr.bf16.mxu1 %v4344_v37 }
 0x129   : > { %2849 = vmatpush3.bf16.msra.mxu0 %v2848_v56 }
 0x12a   : > { %2873 = vmatpush3.bf16.msra.mxu1 %v3817_v20 }
 0x12b   : > { %2875 = vmatprep.subr.bf16.mxu1 %v3851_v42 }
 0x12c   : > { %1858 = vmatmul.mubr.f32.vlgmr.msra.gmra.mrb[10].mxu0 %v3875_v27 }
 0x12e   : > { %2877 = vmatpush3.bf16.msra.mxu1 %v3932_v22 }
 0x12f   : > { %2879 = vmatprep.subr.bf16.mxu1 %v3934_v45 }
 0x132   : > { %2881 = vmatpush3.bf16.msra.mxu1 %v3957_v50 }
 0x135   : > { %1962 = vmatmul.mubr.f32.vlgmr.msra.gmra.mrb[10].mxu1 %v3875_v27 }
 0x15f   : > { %v2110_v36 = vpop.f32.mrb[0].mxu0 }
 0x160   : > { %v2111_v44 = vpop.f32.mrb[1].mxu0 }
 0x161   : > { %v2112_v61 = vadd.f32 %v2111_v44, %v2110_v36 }
 0x168   : > { %v2145_v58 = vpop.f32.mrb[0].mxu1 }
 0x169   : > { %v2146_v41 = vpop.f32.mrb[1].mxu1 }
 0x16a   : > { %v2147_v48 = vadd.f32 %v2146_v41, %v2145_v58 }
 0x16c   : > { %v584_v54 = vadd.f32 %v2147_v48, %v2112_v61 }
 0x17f   : > { %v2180_v20 = vpop.f32.mrb[2].mxu0 }
 0x180   : > { %v2181_v59 = vpop.f32.mrb[3].mxu0 }
 0x181   : > { %v2182_v42 = vadd.f32 %v2181_v59, %v2180_v20 }
 0x183   : > { %v722_v53 = vadd.f32 %v2182_v42, %v584_v54 }
 0x188   : > { %v2215_v47 = vpop.f32.mrb[2].mxu1 }
 0x189   : > { %v2216_v31 = vpop.f32.mrb[3].mxu1 }
 0x18a   : > { %v2217_v22 = vadd.f32 %v2216_v31, %v2215_v47 }
 0x18c   : > { %v830_v23 = vadd.f32 %v2217_v22, %v722_v53 }
 0x19f   : > { %v2250_v45 = vpop.f32.mrb[4].mxu0 }
 0x1a0   : > { %v2251_v37 = vpop.f32.mrb[5].mxu0 }
 0x1a1   : > { %v2252_v50 = vadd.f32 %v2251_v37, %v2250_v45 }
 0x1a3   : > { %v998_v39 = vadd.f32 %v2252_v50, %v830_v23 }
 0x1a8   : > { %v2285_v27 = vpop.f32.mrb[4].mxu1 }
 0x1a9   : > { %v2286_v62 = vpop.f32.mrb[5].mxu1 }
 0x1aa   : > { %v2287_v28 = vadd.f32 %v2286_v62, %v2285_v27 }
 0x1ac   : > { %v1102_v49 = vadd.f32 %v2287_v28, %v998_v39 }
 0x1bf   : > { %v2320_v32 = vpop.f32.mrb[6].mxu0 }
 0x1c0   : > { %v2321_v6 = vpop.f32.mrb[7].mxu0 }
 0x1c1   : > { %v2322_v43 = vadd.f32 %v2321_v6, %v2320_v32 }
 0x1c3   : > { %v1214_v12 = vadd.f32 %v2322_v43, %v1102_v49 }
 0x1c8   : > { %v2355_v7 = vpop.f32.mrb[6].mxu1 }
 0x1c9   : > { %v2356_v33 = vpop.f32.mrb[7].mxu1 }
 0x1ca   : > { %v2357_v21 = vadd.f32 %v2356_v33, %v2355_v7 }
 0x1cc   : > { %v1446_v25 = vadd.f32 %v2357_v21, %v1214_v12 }
 0x1df   : > { %v2390_v2 = vpop.f32.mrb[8].mxu0 }
 0x1e0   : > { %v2391_v57 = vpop.f32.mrb[9].mxu0 }
 0x1e1   : > { %v2392_v40 = vadd.f32 %v2391_v57, %v2390_v2 }
 0x1e3   : > { %v1584_v35 = vadd.f32 %v2392_v40, %v1446_v25 }
 0x1e8   : > { %v2425_v38 = vpop.f32.mrb[8].mxu1 }
 0x1e9   : > { %v2426_v51 = vpop.f32.mrb[9].mxu1 }
 0x1ea   : > { %v2427_v15 = vadd.f32 %v2426_v51, %v2425_v38 }
 0x1ec   : > { %v1692_v1 = vadd.f32 %v2427_v15, %v1584_v35 }
 0x1ff   : > { %v2460_v63 = vpop.f32.mrb[10].mxu0 }
 0x200   : > { %v2461_v60 = vpop.f32.mrb[11].mxu0 }
 0x201   : > { %v2462_v10 = vadd.f32 %v2461_v60, %v2460_v63 }
 0x203   : > { %v1860_v26 = vadd.f32 %v2462_v10, %v1692_v1 }
 0x208   : > { %v2495_v9 = vpop.f32.mrb[10].mxu1 }
 0x209   : > { %v2496_v19 = vpop.f32.mrb[11].mxu1 }
 0x20a   : > { %v2497_v14 = vadd.f32 %v2496_v19, %v2495_v9 }
 0x20c   : > { %v1964_v46 = vadd.f32 %v2497_v14, %v1860_v26 }
 0x20e   : > { %1967 = vst [vmem:[%s174_s27] sm:$0xff] %v1964_v46 }
 0x20f   : > { %3012 = shalt.err (!%p3009_p7)
}
 0x210   : > { %s3013_s7 = scalar_lea.hbm %s4111_s30, 128  ;;  %s3017_s25 = scalar_lea.hbm %s4156_s2, 384 }
 0x211   : > { %p3014_p9 = scmp.ne.s32.totalorder %s4111_s30, %s3013_s7  ;;  %p3018_p0 = scmp.lt.u32.totalorder %s4111_s30, %s4156_s2 }
 0x212   : > { %p3019_p10 = scmp.lt.u32.totalorder %s3017_s25, %s3013_s7  ;;  %p3021_p1 = scmp.lt.u32.totalorder %s3013_s7, %s4111_s30 }
 0x213   : > { %p3015_p11 = pnand %p3014_p9, %p3174_p12 }
 0x214   : > { %p3020_p2 = por %p3019_p10, %p3018_p0 }
 0x215   : > { %p3016_p5 = pneg %p3015_p11 }
 0x216   : > { %p3022_p4 = por %p3021_p1, %p3020_p2 }
 0x218   : > { %p3023_p6 = pnand %p3022_p4, %p3016_p5 }
 0x21a   : > { %3026 = shalt.err (!%p3023_p6)
}
 0x21b   : > { %2888 = dma.vmem_to_hbm [thread:$0]  (%p3174_p12), %s4113_s22, 128, %s4111_s30, %s1969_s3  }
 0x21c PF: > { %p2905_p8 = scmp.ge.s32.totalorder %s3069_s12, 2  ;;  %s1994_s19 = sand.u32 1, %s3057_s9  }
 0x21d   : > { %p4375_p13 = scmp.ne.s32.totalorder %s4252_s16, 0  ;;  %s1995_s29 = scalar_lea.sflag [#allocation4], %s1994_s19 }
 0x21f   : > { %p2899_p3 = pnand %p2905_p8, %p4375_p13 }
 0x221   : > { %3052 = dma.done.wait (!%p2899_p3), %s1995_s29, 128  }
 0x222   : > { %3054 = vsyncadd (!%p2899_p3), %s1995_s29, 4294967168  ;;  %p16_p7 = scmp.ge.s32.totalorder %s3144_s21, 5   ;;  %s4376_s9 = smov %s3061_s10 }
 0x223   : > { %s4377_s10 = smov %s3065_s11  ;;  %s4378_s11 = smov %s3170_s8 }
 0x224   : > { %s4379_s12 = smov %s3144_s21  ;;  %18 = sbr.rel (!%p16_p7) target bundleno = 6 (0x6), region = 77 }
 0x22b   :  { %2000 = vsyncpa [#allocation3], 1 }
 0x22c   :  { %2002 = vsyncpa [#allocation3 + $0x1], 1 }
 0x22d   :  { %2003 = vsyncpa [#allocation6], 1 }
 0x22e   :  { %2004 = vsyncpa [#allocation4], 1 }
 0x22f   :  { %2006 = vsyncpa [#allocation4 + $0x1], 1 }

</bundles_post_ra>
